<compile_context>
chip_gen: v5e
topology: v5e:2x2
jax: 0.10.0
libtpu: 0.0.40
codegen_flags: <defaults>
</compile_context>

<pallas_src>
import math
import numpy as np
import jax
import jax.numpy as jnp
from jax.experimental import pallas as pl
from jax.experimental.pallas import tpu as pltpu

# ---- small, synthetic MiniLM-like config -----------------------------------
VOCAB    = 1000
MAX_POS  = 128
SEQ      = 8
HIDDEN   = 32
HEADS    = 4
HEAD_DIM = HIDDEN // HEADS
FFN      = 64
LAYERS   = 2
LN_EPS   = 1e-12

CLS_ID, SEP_ID, PAD_ID = 101, 102, 0


# ------------------------------ Pallas kernel --------------------------------
def _layernorm(x, g, b):
    mu = jnp.mean(x, axis=-1, keepdims=True)
    var = jnp.mean((x - mu) ** 2, axis=-1, keepdims=True)
    return (x - mu) * jax.lax.rsqrt(var + LN_EPS) * g + b


def fused_encoder_kernel(x_ref, bias_ref,
                         wqkv_ref, bqkv_ref, wo_ref, bo_ref, g1_ref, be1_ref,
                         w1_ref, b1_ref, w2_ref, b2_ref, g2_ref, be2_ref,
                         o_ref, ctx_ref):
    """One grid step == one encoder layer.  o_ref (constant block index across the
    layer axis) doubles as the resident activation carry between layer steps."""
    layer = pl.program_id(0)

    @pl.when(layer == 0)
    def _():
        o_ref[...] = x_ref[...]                    # bring embeddings in once

    x = o_ref[...]                                 # (B*S, H) f32 layer input
    x_bf = x.astype(jnp.bfloat16)

    # Fused QKV projection; 1/sqrt(head_dim) already folded into the Q columns.
    qkv = jnp.dot(x_bf, wqkv_ref[0],
                  preferred_element_type=jnp.float32) + bqkv_ref[0]
    q = qkv[:, 0 * HIDDEN:1 * HIDDEN].astype(jnp.bfloat16)
    k = qkv[:, 1 * HIDDEN:2 * HIDDEN].astype(jnp.bfloat16)
    v = qkv[:, 2 * HIDDEN:3 * HIDDEN].astype(jnp.bfloat16)

    bias = bias_ref[...]                           # (B, S): 0 real / -1e9 pad
    B, S = bias_ref.shape

    # Multi-head attention; each head's context goes straight into ctx scratch.
    for b in range(B):                             # static unroll (B is tiny)
        bias_b = bias[b:b + 1, :]                  # (1, S) additive key mask
        r0 = b * S
        for h in range(HEADS):                     # static unroll
            c0 = h * HEAD_DIM
            qh = q[r0:r0 + S, c0:c0 + HEAD_DIM]
            kh = k[r0:r0 + S, c0:c0 + HEAD_DIM]
            vh = v[r0:r0 + S, c0:c0 + HEAD_DIM]
            s = jax.lax.dot_general(qh, kh, (((1,), (1,)), ((), ())),
                                    preferred_element_type=jnp.float32)
            s = s + bias_b
            s = s - jnp.max(s, axis=-1, keepdims=True)
            p = jnp.exp(s)
            p = p * pl.reciprocal(jnp.sum(p, axis=-1, keepdims=True), approx=True)
            ctx_ref[pl.ds(r0, S), pl.ds(c0, HEAD_DIM)] = jnp.dot(
                p.astype(jnp.bfloat16), vh, preferred_element_type=jnp.float32)

    ctx = ctx_ref[...]
    attn = jnp.dot(ctx.astype(jnp.bfloat16), wo_ref[0],
                   preferred_element_type=jnp.float32) + bo_ref[0]
    h1 = _layernorm(x + attn, g1_ref[0], be1_ref[0])

    ff = jnp.dot(h1.astype(jnp.bfloat16), w1_ref[0],
                 preferred_element_type=jnp.float32) + b1_ref[0]
    # GELU (tanh approximation; exact-erf GELU of HF BERT differs at ~1e-3 level).
    ff = 0.5 * ff * (1.0 + jnp.tanh(0.7978845608028654 *
                                    (ff + 0.044715 * ff * ff * ff)))
    ff = jnp.dot(ff.astype(jnp.bfloat16), w2_ref[0],
                 preferred_element_type=jnp.float32) + b2_ref[0]

    o_ref[...] = _layernorm(h1 + ff, g2_ref[0], be2_ref[0])


def fused_encoder(x_flat, mask_bias, fused_weights):
    """x_flat: (B*S, H) f32, mask_bias: (B, S) f32 additive mask,
    fused_weights: 12 arrays stacked with a leading LAYERS axis."""
    N, H = x_flat.shape
    L = fused_weights[0].shape[0]
    w_specs = [pl.BlockSpec((1,) + tuple(w.shape[1:]), lambda l: (l, 0, 0))
               for w in fused_weights]
    return pl.pallas_call(
        fused_encoder_kernel,
        out_shape=jax.ShapeDtypeStruct((N, H), jnp.float32),
        grid=(L,),
        in_specs=[pl.BlockSpec((N, H), lambda l: (0, 0)),          # activations
                  pl.BlockSpec(tuple(mask_bias.shape), lambda l: (0, 0))] + w_specs,
        out_specs=pl.BlockSpec((N, H), lambda l: (0, 0)),          # resident carry
        scratch_shapes=[pltpu.VMEM((N, H), jnp.float32)],          # per-head ctx slab
        # Layer axis carries state -> "arbitrary".
        # TODO(synk): at real MiniLM/BERT scale, add a "parallel" row-tile grid axis
        # so v7x's two TensorCores both get work, and stream bf16 weights per layer
        # instead of keeping them all resident (v7x VMEM is 64 MiB).
        compiler_params=pltpu.CompilerParams(dimension_semantics=("arbitrary",)),
    )(x_flat, mask_bias, *fused_weights)


# ---------------------------- parameter init ---------------------------------
def init_params(key):
    def w(k, shape):
        return (0.02 * jax.random.normal(k, shape)).astype(jnp.float32)

    ek = jax.random.split(jax.random.fold_in(key, 1000), 2)
    params = {
        "word_emb": w(ek[0], (VOCAB, HIDDEN)),
        "pos_emb":  w(ek[1], (MAX_POS, HIDDEN)),
        "emb_g":    jnp.ones((HIDDEN,), jnp.float32),
        "emb_b":    jnp.zeros((HIDDEN,), jnp.float32),
        "layers":   [],
    }
    for l in range(LAYERS):
        ks = jax.random.split(jax.random.fold_in(key, l), 6)
        zeros_h = jnp.zeros((1, HIDDEN), jnp.float32)
        ones_h = jnp.ones((1, HIDDEN), jnp.float32)
        layer = [
            w(ks[0], (HIDDEN, HIDDEN)), zeros_h,                         # wq, bq
            w(ks[1], (HIDDEN, HIDDEN)), zeros_h,                         # wk, bk
            w(ks[2], (HIDDEN, HIDDEN)), zeros_h,                         # wv, bv
            w(ks[3], (HIDDEN, HIDDEN)), zeros_h,                         # wo, bo
            ones_h, zeros_h,                                             # ln1 g, b
            w(ks[4], (HIDDEN, FFN)), jnp.zeros((1, FFN), jnp.float32),   # w1, b1
            w(ks[5], (FFN, HIDDEN)), zeros_h,                            # w2, b2
            ones_h, zeros_h,                                             # ln2 g, b
        ]
        params["layers"].append(layer)
    return params


def fuse_layer_params(params):
    """Stack per-layer weights along a leading layer axis, fuse Q/K/V into one
    matrix, fold the attention scale into Wq/bq, and downcast matmul operands
    to bf16 (biases / LN params stay f32)."""
    layers = params["layers"]

    def stack(i):
        return jnp.stack([lp[i] for lp in layers])            # (L, ...)

    scale = jnp.float32(1.0 / math.sqrt(HEAD_DIM))
    wq, bq = stack(0) * scale, stack(1) * scale
    wk, bk = stack(2), stack(3)
    wv, bv = stack(4), stack(5)
    wqkv = jnp.concatenate([wq, wk, wv], axis=-1).astype(jnp.bfloat16)   # (L,H,3H)
    bqkv = jnp.concatenate([bq, bk, bv], axis=-1)                        # (L,1,3H)
    wo, bo  = stack(6).astype(jnp.bfloat16), stack(7)
    g1, be1 = stack(8), stack(9)
    w1, b1  = stack(10).astype(jnp.bfloat16), stack(11)
    w2, b2  = stack(12).astype(jnp.bfloat16), stack(13)
    g2, be2 = stack(14), stack(15)
    return (wqkv, bqkv, wo, bo, g1, be1, w1, b1, w2, b2, g2, be2)


# ------------------------------ forward glue ---------------------------------
@jax.jit
def minilm_last_hidden_state(ids, emb_params, fused_weights):
    B, S = ids.shape
    x = jnp.take(emb_params["word_emb"], ids, axis=0) + emb_params["pos_emb"][None, :S, :]
    mu = jnp.mean(x, axis=-1, keepdims=True)
    var = jnp.mean((x - mu) ** 2, axis=-1, keepdims=True)
    x = (x - mu) * jax.lax.rsqrt(var + LN_EPS) * emb_params["emb_g"] + emb_params["emb_b"]
    mask_bias = jnp.where(ids == PAD_ID, -1e9, 0.0).astype(jnp.float32)   # (B, S)
    out = fused_encoder(x.reshape(B * S, HIDDEN), mask_bias, fused_weights)
    return out.reshape(B, S, HIDDEN)                                      # (B, S, H)


def build_hypergraph(sec_sen_num, sen_num, word_nums):
    # TODO(synk): `build_hypergraph` is not defined in the reference module; this is a
    # plausible placeholder incidence matrix (nodes x hyperedges).
    total_nodes = sen_num + int(np.sum(word_nums))
    n_edges = sen_num + len(sec_sen_num)
    H = np.zeros((total_nodes, n_edges), dtype=np.float32)
    word_off = sen_num
    for s in range(sen_num):                       # one hyperedge per sentence
        H[s, s] = 1.0
        H[word_off:word_off + word_nums[s], s] = 1.0
        word_off += word_nums[s]
    sen_off = 0
    for e, cnt in enumerate(sec_sen_num):          # one hyperedge per section
        H[sen_off:sen_off + cnt, sen_num + e] = 1.0
        sen_off += cnt
    return jnp.asarray(H)


def bert_encoder_forward(input_ids_np, sec_sen_num, emb_params, fused_weights):
    ids = jnp.asarray(input_ids_np, jnp.int32)
    output = minilm_last_hidden_state(ids, emb_params, fused_weights)     # (B,S,H)

    sen_idx, word_idx, word_nums = [], [], []
    B, S = input_ids_np.shape
    for i in range(B):                              # host-side, mirrors reference loop
        wn = 0
        for j in range(S):
            tid = int(input_ids_np[i, j])
            if tid == CLS_ID:
                sen_idx.append((i, j))
            elif tid != SEP_ID and tid != PAD_ID:
                word_idx.append((i, j))
                wn += 1
        word_nums.append(wn)

    all_idx = sen_idx + word_idx
    rows = jnp.asarray([p[0] for p in all_idx], jnp.int32)
    cols = jnp.asarray([p[1] for p in all_idx], jnp.int32)
    features = output[rows, cols]                   # (num_nodes, H)

    sen_num = len(sen_idx)
    edges = build_hypergraph(sec_sen_num, sen_num, word_nums)
    return features[None, ...], edges[None, ...], sen_num


# --------------------------------- main ---------------------------------------
if __name__ == "__main__":
    key = jax.random.PRNGKey(0)
    params = init_params(key)
    emb_params = {k: params[k] for k in ("word_emb", "pos_emb", "emb_g", "emb_b")}
    fused_weights = fuse_layer_params(params)       # stacked once, reused every call

    # synthetic tokenizer output: 2 "sentences", padded to SEQ=8
    input_ids = np.array(
        [[101, 11, 12, 13, 102, 0, 0, 0],
         [101, 21, 22, 102, 0, 0, 0, 0]], dtype=np.int32)
    sec_sen_num = [2]    # one section containing both sentences

    features, edges, sen_num = bert_encoder_forward(input_ids, sec_sen_num,
                                                    emb_params, fused_weights)
    jax.block_until_ready(features)
    jax.block_until_ready(edges)

    assert features.shape == (1, 7, HIDDEN), features.shape
    assert edges.shape == (1, 7, 3), edges.shape
    assert sen_num == 2
    print("KERNEL_OK")
</pallas_src>

<mosaic_0001>
module attributes {stable_mosaic.version = 11 : i64} {
  func.func @fused_encoder_kernel(%arg0: i32, %arg1: memref<16x32xf32, #tpu.memory_space<vmem>>, %arg2: memref<2x8xf32, #tpu.memory_space<vmem>>, %arg3: memref<1x32x96xbf16, #tpu.memory_space<vmem>>, %arg4: memref<1x1x96xf32, #tpu.memory_space<vmem>>, %arg5: memref<1x32x32xbf16, #tpu.memory_space<vmem>>, %arg6: memref<1x1x32xf32, #tpu.memory_space<vmem>>, %arg7: memref<1x1x32xf32, #tpu.memory_space<vmem>>, %arg8: memref<1x1x32xf32, #tpu.memory_space<vmem>>, %arg9: memref<1x32x64xbf16, #tpu.memory_space<vmem>>, %arg10: memref<1x1x64xf32, #tpu.memory_space<vmem>>, %arg11: memref<1x64x32xbf16, #tpu.memory_space<vmem>>, %arg12: memref<1x1x32xf32, #tpu.memory_space<vmem>>, %arg13: memref<1x1x32xf32, #tpu.memory_space<vmem>>, %arg14: memref<1x1x32xf32, #tpu.memory_space<vmem>>, %arg15: memref<16x32xf32, #tpu.memory_space<vmem>>, %arg16: memref<16x32xf32, #tpu.memory_space<vmem>>) attributes {dimension_semantics = [#tpu.dimension_semantics<arbitrary>], iteration_bounds = array<i64: 2>, scalar_prefetch = 0 : i64, scratch_operands = 1 : i64, tpu.core_type = #tpu.core_type<tc>, window_params = [{pipeline_mode = #tpu.pipeline_mode<synchronous>, transform_indices = @transform_0, window_bounds = array<i64: 16, 32>}, {pipeline_mode = #tpu.pipeline_mode<synchronous>, transform_indices = @transform_1, window_bounds = array<i64: 2, 8>}, {transform_indices = @transform_2, window_bounds = array<i64: 1, 32, 96>}, {transform_indices = @transform_3, window_bounds = array<i64: 1, 1, 96>}, {transform_indices = @transform_4, window_bounds = array<i64: 1, 32, 32>}, {transform_indices = @transform_5, window_bounds = array<i64: 1, 1, 32>}, {transform_indices = @transform_6, window_bounds = array<i64: 1, 1, 32>}, {transform_indices = @transform_7, window_bounds = array<i64: 1, 1, 32>}, {transform_indices = @transform_8, window_bounds = array<i64: 1, 32, 64>}, {transform_indices = @transform_9, window_bounds = array<i64: 1, 1, 64>}, {transform_indices = @transform_10, window_bounds = array<i64: 1, 64, 32>}, {transform_indices = @transform_11, window_bounds = array<i64: 1, 1, 32>}, {transform_indices = @transform_12, window_bounds = array<i64: 1, 1, 32>}, {transform_indices = @transform_13, window_bounds = array<i64: 1, 1, 32>}, {pipeline_mode = #tpu.pipeline_mode<synchronous>, transform_indices = @transform_14, window_bounds = array<i64: 16, 32>}]} {
    %c0_i32 = arith.constant 0 : i32
    %0 = arith.cmpi eq, %arg0, %c0_i32 : i32
    %1 = arith.extui %0 : i1 to i32
    %c0_i32_0 = arith.constant 0 : i32
    %2 = arith.cmpi ne, %1, %c0_i32_0 : i32
    scf.if %2 {
      %c0_106 = arith.constant 0 : index
      %c0_107 = arith.constant 0 : index
      %266 = vector.load %arg1[%c0_106, %c0_107] : memref<16x32xf32, #tpu.memory_space<vmem>>, vector<16x32xf32>
      %c0_108 = arith.constant 0 : index
      %c0_109 = arith.constant 0 : index
      %267 = vector.load %arg15[%c0_108, %c0_109] : memref<16x32xf32, #tpu.memory_space<vmem>>, vector<16x32xf32>
      tpu.vector_store %arg15[%c0_108, %c0_109], %266 {strides = array<i32>} : memref<16x32xf32, #tpu.memory_space<vmem>>, vector<16x32xf32>,
    } else {
    }
    %c0 = arith.constant 0 : index
    %c0_1 = arith.constant 0 : index
    %3 = vector.load %arg15[%c0, %c0_1] : memref<16x32xf32, #tpu.memory_space<vmem>>, vector<16x32xf32>
    %4 = arith.truncf %3 : vector<16x32xf32> to vector<16x32xbf16>
    %c0_2 = arith.constant 0 : index
    %c0_3 = arith.constant 0 : index
    %c0_4 = arith.constant 0 : index
    %5 = vector.load %arg3[%c0_2, %c0_3, %c0_4] : memref<1x32x96xbf16, #tpu.memory_space<vmem>>, vector<1x32x96xbf16>
    %6 = vector.shape_cast %5 : vector<1x32x96xbf16> to vector<32x96xbf16>
    %cst = arith.constant dense<0.000000e+00> : vector<16x96xf32>
    %7 = tpu.matmul %4, %6, %cst {dimension_numbers = #tpu.dot_dimension_numbers<[1], [0], [0], [1], [0, 0, 1, 1], [], []>} : vector<16x32xbf16>, vector<32x96xbf16>, vector<16x96xf32> -> vector<16x96xf32>
    %c0_5 = arith.constant 0 : index
    %c0_6 = arith.constant 0 : index
    %c0_7 = arith.constant 0 : index
    %8 = vector.load %arg4[%c0_5, %c0_6, %c0_7] : memref<1x1x96xf32, #tpu.memory_space<vmem>>, vector<1x1x96xf32>
    %9 = vector.shape_cast %8 : vector<1x1x96xf32> to vector<1x96xf32>
    %10 = vector.broadcast %9 : vector<1x96xf32> to vector<16x96xf32>
    %11 = arith.addf %7, %10 : vector<16x96xf32>
    %12 = vector.extract_strided_slice %11 {offsets = [0, 0], sizes = [16, 32], strides = [1, 1]} : vector<16x96xf32> to vector<16x32xf32>
    %13 = arith.truncf %12 : vector<16x32xf32> to vector<16x32xbf16>
    %14 = vector.extract_strided_slice %11 {offsets = [0, 32], sizes = [16, 32], strides = [1, 1]} : vector<16x96xf32> to vector<16x32xf32>
    %15 = arith.truncf %14 : vector<16x32xf32> to vector<16x32xbf16>
    %16 = vector.extract_strided_slice %11 {offsets = [0, 64], sizes = [16, 32], strides = [1, 1]} : vector<16x96xf32> to vector<16x32xf32>
    %17 = arith.truncf %16 : vector<16x32xf32> to vector<16x32xbf16>
    %c0_8 = arith.constant 0 : index
    %c0_9 = arith.constant 0 : index
    %18 = vector.load %arg2[%c0_8, %c0_9] : memref<2x8xf32, #tpu.memory_space<vmem>>, vector<2x8xf32>
    %19 = vector.extract_strided_slice %18 {offsets = [0, 0], sizes = [1, 8], strides = [1, 1]} : vector<2x8xf32> to vector<1x8xf32>
    %20 = vector.extract_strided_slice %13 {offsets = [0, 0], sizes = [8, 8], strides = [1, 1]} : vector<16x32xbf16> to vector<8x8xbf16>
    %21 = vector.extract_strided_slice %15 {offsets = [0, 0], sizes = [8, 8], strides = [1, 1]} : vector<16x32xbf16> to vector<8x8xbf16>
    %22 = vector.extract_strided_slice %17 {offsets = [0, 0], sizes = [8, 8], strides = [1, 1]} : vector<16x32xbf16> to vector<8x8xbf16>
    %cst_10 = arith.constant dense<0.000000e+00> : vector<8x8xf32>
    %23 = tpu.matmul %20, %21, %cst_10 {dimension_numbers = #tpu.dot_dimension_numbers<[1], [1], [0], [0], [0, 0, 1, 0], [], []>} : vector<8x8xbf16>, vector<8x8xbf16>, vector<8x8xf32> -> vector<8x8xf32>
    %24 = vector.broadcast %19 : vector<1x8xf32> to vector<8x8xf32>
    %25 = arith.addf %23, %24 : vector<8x8xf32>
    %cst_11 = arith.constant dense<0xFF800000> : vector<8xf32>
    %26 = vector.multi_reduction <maximumf>, %25, %cst_11 [1] : vector<8x8xf32> to vector<8xf32>
    %27 = vector.shape_cast %26 : vector<8xf32> to vector<8x1xf32>
    %28 = vector.broadcast %27 : vector<8x1xf32> to vector<8x8xf32>
    %29 = arith.subf %25, %28 : vector<8x8xf32>
    %30 = math.exp %29 : vector<8x8xf32>
    %cst_12 = arith.constant dense<0.000000e+00> : vector<8xf32>
    %31 = vector.multi_reduction <add>, %30, %cst_12 [1] : vector<8x8xf32> to vector<8xf32>
    %32 = vector.shape_cast %31 : vector<8xf32> to vector<8x1xf32>
    %33 = tpu.reciprocal %32 {approx = true} : vector<8x1xf32> -> vector<8x1xf32>
    %34 = vector.broadcast %33 : vector<8x1xf32> to vector<8x8xf32>
    %35 = arith.mulf %30, %34 : vector<8x8xf32>
    %36 = arith.truncf %35 : vector<8x8xf32> to vector<8x8xbf16>
    %cst_13 = arith.constant dense<0.000000e+00> : vector<8x8xf32>
    %37 = tpu.matmul %36, %22, %cst_13 {dimension_numbers = #tpu.dot_dimension_numbers<[1], [0], [0], [1], [0, 0, 1, 1], [], []>} : vector<8x8xbf16>, vector<8x8xbf16>, vector<8x8xf32> -> vector<8x8xf32>
    %c0_14 = arith.constant 0 : index
    %c0_15 = arith.constant 0 : index
    %38 = vector.load %arg16[%c0_14, %c0_15] : memref<16x32xf32, #tpu.memory_space<vmem>>, vector<8x8xf32>
    tpu.vector_store %arg16[%c0_14, %c0_15], %37 {strides = array<i32>} : memref<16x32xf32, #tpu.memory_space<vmem>>, vector<8x8xf32>,
    %39 = vector.extract_strided_slice %13 {offsets = [0, 8], sizes = [8, 8], strides = [1, 1]} : vector<16x32xbf16> to vector<8x8xbf16>
    %40 = vector.extract_strided_slice %15 {offsets = [0, 8], sizes = [8, 8], strides = [1, 1]} : vector<16x32xbf16> to vector<8x8xbf16>
    %41 = vector.extract_strided_slice %17 {offsets = [0, 8], sizes = [8, 8], strides = [1, 1]} : vector<16x32xbf16> to vector<8x8xbf16>
    %cst_16 = arith.constant dense<0.000000e+00> : vector<8x8xf32>
    %42 = tpu.matmul %39, %40, %cst_16 {dimension_numbers = #tpu.dot_dimension_numbers<[1], [1], [0], [0], [0, 0, 1, 0], [], []>} : vector<8x8xbf16>, vector<8x8xbf16>, vector<8x8xf32> -> vector<8x8xf32>
    %43 = vector.broadcast %19 : vector<1x8xf32> to vector<8x8xf32>
    %44 = arith.addf %42, %43 : vector<8x8xf32>
    %cst_17 = arith.constant dense<0xFF800000> : vector<8xf32>
    %45 = vector.multi_reduction <maximumf>, %44, %cst_17 [1] : vector<8x8xf32> to vector<8xf32>
    %46 = vector.shape_cast %45 : vector<8xf32> to vector<8x1xf32>
    %47 = vector.broadcast %46 : vector<8x1xf32> to vector<8x8xf32>
    %48 = arith.subf %44, %47 : vector<8x8xf32>
    %49 = math.exp %48 : vector<8x8xf32>
    %cst_18 = arith.constant dense<0.000000e+00> : vector<8xf32>
    %50 = vector.multi_reduction <add>, %49, %cst_18 [1] : vector<8x8xf32> to vector<8xf32>
    %51 = vector.shape_cast %50 : vector<8xf32> to vector<8x1xf32>
    %52 = tpu.reciprocal %51 {approx = true} : vector<8x1xf32> -> vector<8x1xf32>
    %53 = vector.broadcast %52 : vector<8x1xf32> to vector<8x8xf32>
    %54 = arith.mulf %49, %53 : vector<8x8xf32>
    %55 = arith.truncf %54 : vector<8x8xf32> to vector<8x8xbf16>
    %cst_19 = arith.constant dense<0.000000e+00> : vector<8x8xf32>
    %56 = tpu.matmul %55, %41, %cst_19 {dimension_numbers = #tpu.dot_dimension_numbers<[1], [0], [0], [1], [0, 0, 1, 1], [], []>} : vector<8x8xbf16>, vector<8x8xbf16>, vector<8x8xf32> -> vector<8x8xf32>
    %c0_20 = arith.constant 0 : index
    %c8 = arith.constant 8 : index
    %57 = vector.load %arg16[%c0_20, %c8] : memref<16x32xf32, #tpu.memory_space<vmem>>, vector<8x8xf32>
    tpu.vector_store %arg16[%c0_20, %c8], %56 {strides = array<i32>} : memref<16x32xf32, #tpu.memory_space<vmem>>, vector<8x8xf32>,
    %58 = vector.extract_strided_slice %13 {offsets = [0, 16], sizes = [8, 8], strides = [1, 1]} : vector<16x32xbf16> to vector<8x8xbf16>
    %59 = vector.extract_strided_slice %15 {offsets = [0, 16], sizes = [8, 8], strides = [1, 1]} : vector<16x32xbf16> to vector<8x8xbf16>
    %60 = vector.extract_strided_slice %17 {offsets = [0, 16], sizes = [8, 8], strides = [1, 1]} : vector<16x32xbf16> to vector<8x8xbf16>
    %cst_21 = arith.constant dense<0.000000e+00> : vector<8x8xf32>
    %61 = tpu.matmul %58, %59, %cst_21 {dimension_numbers = #tpu.dot_dimension_numbers<[1], [1], [0], [0], [0, 0, 1, 0], [], []>} : vector<8x8xbf16>, vector<8x8xbf16>, vector<8x8xf32> -> vector<8x8xf32>
    %62 = vector.broadcast %19 : vector<1x8xf32> to vector<8x8xf32>
    %63 = arith.addf %61, %62 : vector<8x8xf32>
    %cst_22 = arith.constant dense<0xFF800000> : vector<8xf32>
    %64 = vector.multi_reduction <maximumf>, %63, %cst_22 [1] : vector<8x8xf32> to vector<8xf32>
    %65 = vector.shape_cast %64 : vector<8xf32> to vector<8x1xf32>
    %66 = vector.broadcast %65 : vector<8x1xf32> to vector<8x8xf32>
    %67 = arith.subf %63, %66 : vector<8x8xf32>
    %68 = math.exp %67 : vector<8x8xf32>
    %cst_23 = arith.constant dense<0.000000e+00> : vector<8xf32>
    %69 = vector.multi_reduction <add>, %68, %cst_23 [1] : vector<8x8xf32> to vector<8xf32>
    %70 = vector.shape_cast %69 : vector<8xf32> to vector<8x1xf32>
    %71 = tpu.reciprocal %70 {approx = true} : vector<8x1xf32> -> vector<8x1xf32>
    %72 = vector.broadcast %71 : vector<8x1xf32> to vector<8x8xf32>
    %73 = arith.mulf %68, %72 : vector<8x8xf32>
    %74 = arith.truncf %73 : vector<8x8xf32> to vector<8x8xbf16>
    %cst_24 = arith.constant dense<0.000000e+00> : vector<8x8xf32>
    %75 = tpu.matmul %74, %60, %cst_24 {dimension_numbers = #tpu.dot_dimension_numbers<[1], [0], [0], [1], [0, 0, 1, 1], [], []>} : vector<8x8xbf16>, vector<8x8xbf16>, vector<8x8xf32> -> vector<8x8xf32>
    %c0_25 = arith.constant 0 : index
    %c16 = arith.constant 16 : index
    %76 = vector.load %arg16[%c0_25, %c16] : memref<16x32xf32, #tpu.memory_space<vmem>>, vector<8x8xf32>
    tpu.vector_store %arg16[%c0_25, %c16], %75 {strides = array<i32>} : memref<16x32xf32, #tpu.memory_space<vmem>>, vector<8x8xf32>,
    %77 = vector.extract_strided_slice %13 {offsets = [0, 24], sizes = [8, 8], strides = [1, 1]} : vector<16x32xbf16> to vector<8x8xbf16>
    %78 = vector.extract_strided_slice %15 {offsets = [0, 24], sizes = [8, 8], strides = [1, 1]} : vector<16x32xbf16> to vector<8x8xbf16>
    %79 = vector.extract_strided_slice %17 {offsets = [0, 24], sizes = [8, 8], strides = [1, 1]} : vector<16x32xbf16> to vector<8x8xbf16>
    %cst_26 = arith.constant dense<0.000000e+00> : vector<8x8xf32>
    %80 = tpu.matmul %77, %78, %cst_26 {dimension_numbers = #tpu.dot_dimension_numbers<[1], [1], [0], [0], [0, 0, 1, 0], [], []>} : vector<8x8xbf16>, vector<8x8xbf16>, vector<8x8xf32> -> vector<8x8xf32>
    %81 = vector.broadcast %19 : vector<1x8xf32> to vector<8x8xf32>
    %82 = arith.addf %80, %81 : vector<8x8xf32>
    %cst_27 = arith.constant dense<0xFF800000> : vector<8xf32>
    %83 = vector.multi_reduction <maximumf>, %82, %cst_27 [1] : vector<8x8xf32> to vector<8xf32>
    %84 = vector.shape_cast %83 : vector<8xf32> to vector<8x1xf32>
    %85 = vector.broadcast %84 : vector<8x1xf32> to vector<8x8xf32>
    %86 = arith.subf %82, %85 : vector<8x8xf32>
    %87 = math.exp %86 : vector<8x8xf32>
    %cst_28 = arith.constant dense<0.000000e+00> : vector<8xf32>
    %88 = vector.multi_reduction <add>, %87, %cst_28 [1] : vector<8x8xf32> to vector<8xf32>
    %89 = vector.shape_cast %88 : vector<8xf32> to vector<8x1xf32>
    %90 = tpu.reciprocal %89 {approx = true} : vector<8x1xf32> -> vector<8x1xf32>
    %91 = vector.broadcast %90 : vector<8x1xf32> to vector<8x8xf32>
    %92 = arith.mulf %87, %91 : vector<8x8xf32>
    %93 = arith.truncf %92 : vector<8x8xf32> to vector<8x8xbf16>
    %cst_29 = arith.constant dense<0.000000e+00> : vector<8x8xf32>
    %94 = tpu.matmul %93, %79, %cst_29 {dimension_numbers = #tpu.dot_dimension_numbers<[1], [0], [0], [1], [0, 0, 1, 1], [], []>} : vector<8x8xbf16>, vector<8x8xbf16>, vector<8x8xf32> -> vector<8x8xf32>
    %c0_30 = arith.constant 0 : index
    %c24 = arith.constant 24 : index
    %95 = vector.load %arg16[%c0_30, %c24] : memref<16x32xf32, #tpu.memory_space<vmem>>, vector<8x8xf32>
    tpu.vector_store %arg16[%c0_30, %c24], %94 {strides = array<i32>} : memref<16x32xf32, #tpu.memory_space<vmem>>, vector<8x8xf32>,
    %96 = vector.extract_strided_slice %18 {offsets = [1, 0], sizes = [1, 8], strides = [1, 1]} : vector<2x8xf32> to vector<1x8xf32>
    %97 = vector.extract_strided_slice %13 {offsets = [8, 0], sizes = [8, 8], strides = [1, 1]} : vector<16x32xbf16> to vector<8x8xbf16>
    %98 = vector.extract_strided_slice %15 {offsets = [8, 0], sizes = [8, 8], strides = [1, 1]} : vector<16x32xbf16> to vector<8x8xbf16>
    %99 = vector.extract_strided_slice %17 {offsets = [8, 0], sizes = [8, 8], strides = [1, 1]} : vector<16x32xbf16> to vector<8x8xbf16>
    %cst_31 = arith.constant dense<0.000000e+00> : vector<8x8xf32>
    %100 = tpu.matmul %97, %98, %cst_31 {dimension_numbers = #tpu.dot_dimension_numbers<[1], [1], [0], [0], [0, 0, 1, 0], [], []>} : vector<8x8xbf16>, vector<8x8xbf16>, vector<8x8xf32> -> vector<8x8xf32>
    %101 = vector.broadcast %96 : vector<1x8xf32> to vector<8x8xf32>
    %102 = arith.addf %100, %101 : vector<8x8xf32>
    %cst_32 = arith.constant dense<0xFF800000> : vector<8xf32>
    %103 = vector.multi_reduction <maximumf>, %102, %cst_32 [1] : vector<8x8xf32> to vector<8xf32>
    %104 = vector.shape_cast %103 : vector<8xf32> to vector<8x1xf32>
    %105 = vector.broadcast %104 : vector<8x1xf32> to vector<8x8xf32>
    %106 = arith.subf %102, %105 : vector<8x8xf32>
    %107 = math.exp %106 : vector<8x8xf32>
    %cst_33 = arith.constant dense<0.000000e+00> : vector<8xf32>
    %108 = vector.multi_reduction <add>, %107, %cst_33 [1] : vector<8x8xf32> to vector<8xf32>
    %109 = vector.shape_cast %108 : vector<8xf32> to vector<8x1xf32>
    %110 = tpu.reciprocal %109 {approx = true} : vector<8x1xf32> -> vector<8x1xf32>
    %111 = vector.broadcast %110 : vector<8x1xf32> to vector<8x8xf32>
    %112 = arith.mulf %107, %111 : vector<8x8xf32>
    %113 = arith.truncf %112 : vector<8x8xf32> to vector<8x8xbf16>
    %cst_34 = arith.constant dense<0.000000e+00> : vector<8x8xf32>
    %114 = tpu.matmul %113, %99, %cst_34 {dimension_numbers = #tpu.dot_dimension_numbers<[1], [0], [0], [1], [0, 0, 1, 1], [], []>} : vector<8x8xbf16>, vector<8x8xbf16>, vector<8x8xf32> -> vector<8x8xf32>
    %c8_35 = arith.constant 8 : index
    %c0_36 = arith.constant 0 : index
    %115 = vector.load %arg16[%c8_35, %c0_36] : memref<16x32xf32, #tpu.memory_space<vmem>>, vector<8x8xf32>
    tpu.vector_store %arg16[%c8_35, %c0_36], %114 {strides = array<i32>} : memref<16x32xf32, #tpu.memory_space<vmem>>, vector<8x8xf32>,
    %116 = vector.extract_strided_slice %13 {offsets = [8, 8], sizes = [8, 8], strides = [1, 1]} : vector<16x32xbf16> to vector<8x8xbf16>
    %117 = vector.extract_strided_slice %15 {offsets = [8, 8], sizes = [8, 8], strides = [1, 1]} : vector<16x32xbf16> to vector<8x8xbf16>
    %118 = vector.extract_strided_slice %17 {offsets = [8, 8], sizes = [8, 8], strides = [1, 1]} : vector<16x32xbf16> to vector<8x8xbf16>
    %cst_37 = arith.constant dense<0.000000e+00> : vector<8x8xf32>
    %119 = tpu.matmul %116, %117, %cst_37 {dimension_numbers = #tpu.dot_dimension_numbers<[1], [1], [0], [0], [0, 0, 1, 0], [], []>} : vector<8x8xbf16>, vector<8x8xbf16>, vector<8x8xf32> -> vector<8x8xf32>
    %120 = vector.broadcast %96 : vector<1x8xf32> to vector<8x8xf32>
    %121 = arith.addf %119, %120 : vector<8x8xf32>
    %cst_38 = arith.constant dense<0xFF800000> : vector<8xf32>
    %122 = vector.multi_reduction <maximumf>, %121, %cst_38 [1] : vector<8x8xf32> to vector<8xf32>
    %123 = vector.shape_cast %122 : vector<8xf32> to vector<8x1xf32>
    %124 = vector.broadcast %123 : vector<8x1xf32> to vector<8x8xf32>
    %125 = arith.subf %121, %124 : vector<8x8xf32>
    %126 = math.exp %125 : vector<8x8xf32>
    %cst_39 = arith.constant dense<0.000000e+00> : vector<8xf32>
    %127 = vector.multi_reduction <add>, %126, %cst_39 [1] : vector<8x8xf32> to vector<8xf32>
    %128 = vector.shape_cast %127 : vector<8xf32> to vector<8x1xf32>
    %129 = tpu.reciprocal %128 {approx = true} : vector<8x1xf32> -> vector<8x1xf32>
    %130 = vector.broadcast %129 : vector<8x1xf32> to vector<8x8xf32>
    %131 = arith.mulf %126, %130 : vector<8x8xf32>
    %132 = arith.truncf %131 : vector<8x8xf32> to vector<8x8xbf16>
    %cst_40 = arith.constant dense<0.000000e+00> : vector<8x8xf32>
    %133 = tpu.matmul %132, %118, %cst_40 {dimension_numbers = #tpu.dot_dimension_numbers<[1], [0], [0], [1], [0, 0, 1, 1], [], []>} : vector<8x8xbf16>, vector<8x8xbf16>, vector<8x8xf32> -> vector<8x8xf32>
    %c8_41 = arith.constant 8 : index
    %c8_42 = arith.constant 8 : index
    %134 = vector.load %arg16[%c8_41, %c8_42] : memref<16x32xf32, #tpu.memory_space<vmem>>, vector<8x8xf32>
    tpu.vector_store %arg16[%c8_41, %c8_42], %133 {strides = array<i32>} : memref<16x32xf32, #tpu.memory_space<vmem>>, vector<8x8xf32>,
    %135 = vector.extract_strided_slice %13 {offsets = [8, 16], sizes = [8, 8], strides = [1, 1]} : vector<16x32xbf16> to vector<8x8xbf16>
    %136 = vector.extract_strided_slice %15 {offsets = [8, 16], sizes = [8, 8], strides = [1, 1]} : vector<16x32xbf16> to vector<8x8xbf16>
    %137 = vector.extract_strided_slice %17 {offsets = [8, 16], sizes = [8, 8], strides = [1, 1]} : vector<16x32xbf16> to vector<8x8xbf16>
    %cst_43 = arith.constant dense<0.000000e+00> : vector<8x8xf32>
    %138 = tpu.matmul %135, %136, %cst_43 {dimension_numbers = #tpu.dot_dimension_numbers<[1], [1], [0], [0], [0, 0, 1, 0], [], []>} : vector<8x8xbf16>, vector<8x8xbf16>, vector<8x8xf32> -> vector<8x8xf32>
    %139 = vector.broadcast %96 : vector<1x8xf32> to vector<8x8xf32>
    %140 = arith.addf %138, %139 : vector<8x8xf32>
    %cst_44 = arith.constant dense<0xFF800000> : vector<8xf32>
    %141 = vector.multi_reduction <maximumf>, %140, %cst_44 [1] : vector<8x8xf32> to vector<8xf32>
    %142 = vector.shape_cast %141 : vector<8xf32> to vector<8x1xf32>
    %143 = vector.broadcast %142 : vector<8x1xf32> to vector<8x8xf32>
    %144 = arith.subf %140, %143 : vector<8x8xf32>
    %145 = math.exp %144 : vector<8x8xf32>
    %cst_45 = arith.constant dense<0.000000e+00> : vector<8xf32>
    %146 = vector.multi_reduction <add>, %145, %cst_45 [1] : vector<8x8xf32> to vector<8xf32>
    %147 = vector.shape_cast %146 : vector<8xf32> to vector<8x1xf32>
    %148 = tpu.reciprocal %147 {approx = true} : vector<8x1xf32> -> vector<8x1xf32>
    %149 = vector.broadcast %148 : vector<8x1xf32> to vector<8x8xf32>
    %150 = arith.mulf %145, %149 : vector<8x8xf32>
    %151 = arith.truncf %150 : vector<8x8xf32> to vector<8x8xbf16>
    %cst_46 = arith.constant dense<0.000000e+00> : vector<8x8xf32>
    %152 = tpu.matmul %151, %137, %cst_46 {dimension_numbers = #tpu.dot_dimension_numbers<[1], [0], [0], [1], [0, 0, 1, 1], [], []>} : vector<8x8xbf16>, vector<8x8xbf16>, vector<8x8xf32> -> vector<8x8xf32>
    %c8_47 = arith.constant 8 : index
    %c16_48 = arith.constant 16 : index
    %153 = vector.load %arg16[%c8_47, %c16_48] : memref<16x32xf32, #tpu.memory_space<vmem>>, vector<8x8xf32>
    tpu.vector_store %arg16[%c8_47, %c16_48], %152 {strides = array<i32>} : memref<16x32xf32, #tpu.memory_space<vmem>>, vector<8x8xf32>,
    %154 = vector.extract_strided_slice %13 {offsets = [8, 24], sizes = [8, 8], strides = [1, 1]} : vector<16x32xbf16> to vector<8x8xbf16>
    %155 = vector.extract_strided_slice %15 {offsets = [8, 24], sizes = [8, 8], strides = [1, 1]} : vector<16x32xbf16> to vector<8x8xbf16>
    %156 = vector.extract_strided_slice %17 {offsets = [8, 24], sizes = [8, 8], strides = [1, 1]} : vector<16x32xbf16> to vector<8x8xbf16>
    %cst_49 = arith.constant dense<0.000000e+00> : vector<8x8xf32>
    %157 = tpu.matmul %154, %155, %cst_49 {dimension_numbers = #tpu.dot_dimension_numbers<[1], [1], [0], [0], [0, 0, 1, 0], [], []>} : vector<8x8xbf16>, vector<8x8xbf16>, vector<8x8xf32> -> vector<8x8xf32>
    %158 = vector.broadcast %96 : vector<1x8xf32> to vector<8x8xf32>
    %159 = arith.addf %157, %158 : vector<8x8xf32>
    %cst_50 = arith.constant dense<0xFF800000> : vector<8xf32>
    %160 = vector.multi_reduction <maximumf>, %159, %cst_50 [1] : vector<8x8xf32> to vector<8xf32>
    %161 = vector.shape_cast %160 : vector<8xf32> to vector<8x1xf32>
    %162 = vector.broadcast %161 : vector<8x1xf32> to vector<8x8xf32>
    %163 = arith.subf %159, %162 : vector<8x8xf32>
    %164 = math.exp %163 : vector<8x8xf32>
    %cst_51 = arith.constant dense<0.000000e+00> : vector<8xf32>
    %165 = vector.multi_reduction <add>, %164, %cst_51 [1] : vector<8x8xf32> to vector<8xf32>
    %166 = vector.shape_cast %165 : vector<8xf32> to vector<8x1xf32>
    %167 = tpu.reciprocal %166 {approx = true} : vector<8x1xf32> -> vector<8x1xf32>
    %168 = vector.broadcast %167 : vector<8x1xf32> to vector<8x8xf32>
    %169 = arith.mulf %164, %168 : vector<8x8xf32>
    %170 = arith.truncf %169 : vector<8x8xf32> to vector<8x8xbf16>
    %cst_52 = arith.constant dense<0.000000e+00> : vector<8x8xf32>
    %171 = tpu.matmul %170, %156, %cst_52 {dimension_numbers = #tpu.dot_dimension_numbers<[1], [0], [0], [1], [0, 0, 1, 1], [], []>} : vector<8x8xbf16>, vector<8x8xbf16>, vector<8x8xf32> -> vector<8x8xf32>
    %c8_53 = arith.constant 8 : index
    %c24_54 = arith.constant 24 : index
    %172 = vector.load %arg16[%c8_53, %c24_54] : memref<16x32xf32, #tpu.memory_space<vmem>>, vector<8x8xf32>
    tpu.vector_store %arg16[%c8_53, %c24_54], %171 {strides = array<i32>} : memref<16x32xf32, #tpu.memory_space<vmem>>, vector<8x8xf32>,
    %c0_55 = arith.constant 0 : index
    %c0_56 = arith.constant 0 : index
    %173 = vector.load %arg16[%c0_55, %c0_56] : memref<16x32xf32, #tpu.memory_space<vmem>>, vector<16x32xf32>
    %174 = arith.truncf %173 : vector<16x32xf32> to vector<16x32xbf16>
    %c0_57 = arith.constant 0 : index
    %c0_58 = arith.constant 0 : index
    %c0_59 = arith.constant 0 : index
    %175 = vector.load %arg5[%c0_57, %c0_58, %c0_59] : memref<1x32x32xbf16, #tpu.memory_space<vmem>>, vector<1x32x32xbf16>
    %176 = vector.shape_cast %175 : vector<1x32x32xbf16> to vector<32x32xbf16>
    %cst_60 = arith.constant dense<0.000000e+00> : vector<16x32xf32>
    %177 = tpu.matmul %174, %176, %cst_60 {dimension_numbers = #tpu.dot_dimension_numbers<[1], [0], [0], [1], [0, 0, 1, 1], [], []>} : vector<16x32xbf16>, vector<32x32xbf16>, vector<16x32xf32> -> vector<16x32xf32>
    %c0_61 = arith.constant 0 : index
    %c0_62 = arith.constant 0 : index
    %c0_63 = arith.constant 0 : index
    %178 = vector.load %arg6[%c0_61, %c0_62, %c0_63] : memref<1x1x32xf32, #tpu.memory_space<vmem>>, vector<1x1x32xf32>
    %179 = vector.shape_cast %178 : vector<1x1x32xf32> to vector<1x32xf32>
    %180 = vector.broadcast %179 : vector<1x32xf32> to vector<16x32xf32>
    %181 = arith.addf %177, %180 : vector<16x32xf32>
    %182 = arith.addf %3, %181 : vector<16x32xf32>
    %c0_64 = arith.constant 0 : index
    %c0_65 = arith.constant 0 : index
    %c0_66 = arith.constant 0 : index
    %183 = vector.load %arg7[%c0_64, %c0_65, %c0_66] : memref<1x1x32xf32, #tpu.memory_space<vmem>>, vector<1x1x32xf32>
    %184 = vector.shape_cast %183 : vector<1x1x32xf32> to vector<1x32xf32>
    %c0_67 = arith.constant 0 : index
    %c0_68 = arith.constant 0 : index
    %c0_69 = arith.constant 0 : index
    %185 = vector.load %arg8[%c0_67, %c0_68, %c0_69] : memref<1x1x32xf32, #tpu.memory_space<vmem>>, vector<1x1x32xf32>
    %186 = vector.shape_cast %185 : vector<1x1x32xf32> to vector<1x32xf32>
    %cst_70 = arith.constant dense<0.000000e+00> : vector<16xf32>
    %187 = vector.multi_reduction <add>, %182, %cst_70 [1] : vector<16x32xf32> to vector<16xf32>
    %188 = vector.shape_cast %187 : vector<16xf32> to vector<16x1xf32>
    %cst_71 = arith.constant 3.200000e+01 : f32
    %189 = vector.broadcast %cst_71 : f32 to vector<16x1xf32>
    %190 = arith.divf %188, %189 : vector<16x1xf32>
    %191 = vector.broadcast %190 : vector<16x1xf32> to vector<16x32xf32>
    %192 = arith.subf %182, %191 : vector<16x32xf32>
    %193 = arith.mulf %192, %192 : vector<16x32xf32>
    %cst_72 = arith.constant dense<0.000000e+00> : vector<16xf32>
    %194 = vector.multi_reduction <add>, %193, %cst_72 [1] : vector<16x32xf32> to vector<16xf32>
    %195 = vector.shape_cast %194 : vector<16xf32> to vector<16x1xf32>
    %cst_73 = arith.constant 3.200000e+01 : f32
    %196 = vector.broadcast %cst_73 : f32 to vector<16x1xf32>
    %197 = arith.divf %195, %196 : vector<16x1xf32>
    %198 = vector.broadcast %190 : vector<16x1xf32> to vector<16x32xf32>
    %199 = arith.subf %182, %198 : vector<16x32xf32>
    %cst_74 = arith.constant 9.99999996E-13 : f32
    %200 = vector.broadcast %cst_74 : f32 to vector<16x1xf32>
    %201 = arith.addf %197, %200 : vector<16x1xf32>
    %202 = math.rsqrt %201 : vector<16x1xf32>
    %203 = vector.broadcast %202 : vector<16x1xf32> to vector<16x32xf32>
    %204 = arith.mulf %199, %203 : vector<16x32xf32>
    %205 = vector.broadcast %184 : vector<1x32xf32> to vector<16x32xf32>
    %206 = arith.mulf %204, %205 : vector<16x32xf32>
    %207 = vector.broadcast %186 : vector<1x32xf32> to vector<16x32xf32>
    %208 = arith.addf %206, %207 : vector<16x32xf32>
    %209 = arith.truncf %208 : vector<16x32xf32> to vector<16x32xbf16>
    %c0_75 = arith.constant 0 : index
    %c0_76 = arith.constant 0 : index
    %c0_77 = arith.constant 0 : index
    %210 = vector.load %arg9[%c0_75, %c0_76, %c0_77] : memref<1x32x64xbf16, #tpu.memory_space<vmem>>, vector<1x32x64xbf16>
    %211 = vector.shape_cast %210 : vector<1x32x64xbf16> to vector<32x64xbf16>
    %cst_78 = arith.constant dense<0.000000e+00> : vector<16x64xf32>
    %212 = tpu.matmul %209, %211, %cst_78 {dimension_numbers = #tpu.dot_dimension_numbers<[1], [0], [0], [1], [0, 0, 1, 1], [], []>} : vector<16x32xbf16>, vector<32x64xbf16>, vector<16x64xf32> -> vector<16x64xf32>
    %c0_79 = arith.constant 0 : index
    %c0_80 = arith.constant 0 : index
    %c0_81 = arith.constant 0 : index
    %213 = vector.load %arg10[%c0_79, %c0_80, %c0_81] : memref<1x1x64xf32, #tpu.memory_space<vmem>>, vector<1x1x64xf32>
    %214 = vector.shape_cast %213 : vector<1x1x64xf32> to vector<1x64xf32>
    %215 = vector.broadcast %214 : vector<1x64xf32> to vector<16x64xf32>
    %216 = arith.addf %212, %215 : vector<16x64xf32>
    %cst_82 = arith.constant 5.000000e-01 : f32
    %217 = vector.broadcast %cst_82 : f32 to vector<16x64xf32>
    %218 = arith.mulf %217, %216 : vector<16x64xf32>
    %cst_83 = arith.constant 4.471500e-02 : f32
    %219 = vector.broadcast %cst_83 : f32 to vector<16x64xf32>
    %220 = arith.mulf %219, %216 : vector<16x64xf32>
    %221 = arith.mulf %220, %216 : vector<16x64xf32>
    %222 = arith.mulf %221, %216 : vector<16x64xf32>
    %223 = arith.addf %216, %222 : vector<16x64xf32>
    %cst_84 = arith.constant 0.797884583 : f32
    %224 = vector.broadcast %cst_84 : f32 to vector<16x64xf32>
    %225 = arith.mulf %224, %223 : vector<16x64xf32>
    %226 = math.tanh %225 : vector<16x64xf32>
    %cst_85 = arith.constant 1.000000e+00 : f32
    %227 = vector.broadcast %cst_85 : f32 to vector<16x64xf32>
    %228 = arith.addf %227, %226 : vector<16x64xf32>
    %229 = arith.mulf %218, %228 : vector<16x64xf32>
    %230 = arith.truncf %229 : vector<16x64xf32> to vector<16x64xbf16>
    %c0_86 = arith.constant 0 : index
    %c0_87 = arith.constant 0 : index
    %c0_88 = arith.constant 0 : index
    %231 = vector.load %arg11[%c0_86, %c0_87, %c0_88] : memref<1x64x32xbf16, #tpu.memory_space<vmem>>, vector<1x64x32xbf16>
    %232 = vector.shape_cast %231 : vector<1x64x32xbf16> to vector<64x32xbf16>
    %cst_89 = arith.constant dense<0.000000e+00> : vector<16x32xf32>
    %233 = tpu.matmul %230, %232, %cst_89 {dimension_numbers = #tpu.dot_dimension_numbers<[1], [0], [0], [1], [0, 0, 1, 1], [], []>} : vector<16x64xbf16>, vector<64x32xbf16>, vector<16x32xf32> -> vector<16x32xf32>
    %c0_90 = arith.constant 0 : index
    %c0_91 = arith.constant 0 : index
    %c0_92 = arith.constant 0 : index
    %234 = vector.load %arg12[%c0_90, %c0_91, %c0_92] : memref<1x1x32xf32, #tpu.memory_space<vmem>>, vector<1x1x32xf32>
    %235 = vector.shape_cast %234 : vector<1x1x32xf32> to vector<1x32xf32>
    %236 = vector.broadcast %235 : vector<1x32xf32> to vector<16x32xf32>
    %237 = arith.addf %233, %236 : vector<16x32xf32>
    %238 = arith.addf %208, %237 : vector<16x32xf32>
    %c0_93 = arith.constant 0 : index
    %c0_94 = arith.constant 0 : index
    %c0_95 = arith.constant 0 : index
    %239 = vector.load %arg13[%c0_93, %c0_94, %c0_95] : memref<1x1x32xf32, #tpu.memory_space<vmem>>, vector<1x1x32xf32>
    %240 = vector.shape_cast %239 : vector<1x1x32xf32> to vector<1x32xf32>
    %c0_96 = arith.constant 0 : index
    %c0_97 = arith.constant 0 : index
    %c0_98 = arith.constant 0 : index
    %241 = vector.load %arg14[%c0_96, %c0_97, %c0_98] : memref<1x1x32xf32, #tpu.memory_space<vmem>>, vector<1x1x32xf32>
    %242 = vector.shape_cast %241 : vector<1x1x32xf32> to vector<1x32xf32>
    %cst_99 = arith.constant dense<0.000000e+00> : vector<16xf32>
    %243 = vector.multi_reduction <add>, %238, %cst_99 [1] : vector<16x32xf32> to vector<16xf32>
    %244 = vector.shape_cast %243 : vector<16xf32> to vector<16x1xf32>
    %cst_100 = arith.constant 3.200000e+01 : f32
    %245 = vector.broadcast %cst_100 : f32 to vector<16x1xf32>
    %246 = arith.divf %244, %245 : vector<16x1xf32>
    %247 = vector.broadcast %246 : vector<16x1xf32> to vector<16x32xf32>
    %248 = arith.subf %238, %247 : vector<16x32xf32>
    %249 = arith.mulf %248, %248 : vector<16x32xf32>
    %cst_101 = arith.constant dense<0.000000e+00> : vector<16xf32>
    %250 = vector.multi_reduction <add>, %249, %cst_101 [1] : vector<16x32xf32> to vector<16xf32>
    %251 = vector.shape_cast %250 : vector<16xf32> to vector<16x1xf32>
    %cst_102 = arith.constant 3.200000e+01 : f32
    %252 = vector.broadcast %cst_102 : f32 to vector<16x1xf32>
    %253 = arith.divf %251, %252 : vector<16x1xf32>
    %254 = vector.broadcast %246 : vector<16x1xf32> to vector<16x32xf32>
    %255 = arith.subf %238, %254 : vector<16x32xf32>
    %cst_103 = arith.constant 9.99999996E-13 : f32
    %256 = vector.broadcast %cst_103 : f32 to vector<16x1xf32>
    %257 = arith.addf %253, %256 : vector<16x1xf32>
    %258 = math.rsqrt %257 : vector<16x1xf32>
    %259 = vector.broadcast %258 : vector<16x1xf32> to vector<16x32xf32>
    %260 = arith.mulf %255, %259 : vector<16x32xf32>
    %261 = vector.broadcast %240 : vector<1x32xf32> to vector<16x32xf32>
    %262 = arith.mulf %260, %261 : vector<16x32xf32>
    %263 = vector.broadcast %242 : vector<1x32xf32> to vector<16x32xf32>
    %264 = arith.addf %262, %263 : vector<16x32xf32>
    %c0_104 = arith.constant 0 : index
    %c0_105 = arith.constant 0 : index
    %265 = vector.load %arg15[%c0_104, %c0_105] : memref<16x32xf32, #tpu.memory_space<vmem>>, vector<16x32xf32>
    tpu.vector_store %arg15[%c0_104, %c0_105], %264 {strides = array<i32>} : memref<16x32xf32, #tpu.memory_space<vmem>>, vector<16x32xf32>,
    return
  }
  func.func @transform_0(%arg0: i32) -> (i32, i32) {
    %c0_i32 = arith.constant 0 : i32
    %c0_i32_0 = arith.constant 0 : i32
    %c0_i32_1 = arith.constant 0 : i32
    return %c0_i32, %c0_i32_0 : i32, i32
  }
  func.func @transform_1(%arg0: i32) -> (i32, i32) {
    %c0_i32 = arith.constant 0 : i32
    %c0_i32_0 = arith.constant 0 : i32
    %c0_i32_1 = arith.constant 0 : i32
    return %c0_i32, %c0_i32_0 : i32, i32
  }
  func.func @transform_2(%arg0: i32) -> (i32, i32, i32) {
    %c0_i32 = arith.constant 0 : i32
    %c0_i32_0 = arith.constant 0 : i32
    %c0_i32_1 = arith.constant 0 : i32
    return %arg0, %c0_i32, %c0_i32_0 : i32, i32, i32
  }
  func.func @transform_3(%arg0: i32) -> (i32, i32, i32) {
    %c0_i32 = arith.constant 0 : i32
    %c0_i32_0 = arith.constant 0 : i32
    %c0_i32_1 = arith.constant 0 : i32
    return %arg0, %c0_i32, %c0_i32_0 : i32, i32, i32
  }
  func.func @transform_4(%arg0: i32) -> (i32, i32, i32) {
    %c0_i32 = arith.constant 0 : i32
    %c0_i32_0 = arith.constant 0 : i32
    %c0_i32_1 = arith.constant 0 : i32
    return %arg0, %c0_i32, %c0_i32_0 : i32, i32, i32
  }
  func.func @transform_5(%arg0: i32) -> (i32, i32, i32) {
    %c0_i32 = arith.constant 0 : i32
    %c0_i32_0 = arith.constant 0 : i32
    %c0_i32_1 = arith.constant 0 : i32
    return %arg0, %c0_i32, %c0_i32_0 : i32, i32, i32
  }
  func.func @transform_6(%arg0: i32) -> (i32, i32, i32) {
    %c0_i32 = arith.constant 0 : i32
    %c0_i32_0 = arith.constant 0 : i32
    %c0_i32_1 = arith.constant 0 : i32
    return %arg0, %c0_i32, %c0_i32_0 : i32, i32, i32
  }
  func.func @transform_7(%arg0: i32) -> (i32, i32, i32) {
    %c0_i32 = arith.constant 0 : i32
    %c0_i32_0 = arith.constant 0 : i32
    %c0_i32_1 = arith.constant 0 : i32
    return %arg0, %c0_i32, %c0_i32_0 : i32, i32, i32
  }
  func.func @transform_8(%arg0: i32) -> (i32, i32, i32) {
    %c0_i32 = arith.constant 0 : i32
    %c0_i32_0 = arith.constant 0 : i32
    %c0_i32_1 = arith.constant 0 : i32
    return %arg0, %c0_i32, %c0_i32_0 : i32, i32, i32
  }
  func.func @transform_9(%arg0: i32) -> (i32, i32, i32) {
    %c0_i32 = arith.constant 0 : i32
    %c0_i32_0 = arith.constant 0 : i32
    %c0_i32_1 = arith.constant 0 : i32
    return %arg0, %c0_i32, %c0_i32_0 : i32, i32, i32
  }
  func.func @transform_10(%arg0: i32) -> (i32, i32, i32) {
    %c0_i32 = arith.constant 0 : i32
    %c0_i32_0 = arith.constant 0 : i32
    %c0_i32_1 = arith.constant 0 : i32
    return %arg0, %c0_i32, %c0_i32_0 : i32, i32, i32
  }
  func.func @transform_11(%arg0: i32) -> (i32, i32, i32) {
    %c0_i32 = arith.constant 0 : i32
    %c0_i32_0 = arith.constant 0 : i32
    %c0_i32_1 = arith.constant 0 : i32
    return %arg0, %c0_i32, %c0_i32_0 : i32, i32, i32
  }
  func.func @transform_12(%arg0: i32) -> (i32, i32, i32) {
    %c0_i32 = arith.constant 0 : i32
    %c0_i32_0 = arith.constant 0 : i32
    %c0_i32_1 = arith.constant 0 : i32
    return %arg0, %c0_i32, %c0_i32_0 : i32, i32, i32
  }
  func.func @transform_13(%arg0: i32) -> (i32, i32, i32) {
    %c0_i32 = arith.constant 0 : i32
    %c0_i32_0 = arith.constant 0 : i32
    %c0_i32_1 = arith.constant 0 : i32
    return %arg0, %c0_i32, %c0_i32_0 : i32, i32, i32
  }
  func.func @transform_14(%arg0: i32) -> (i32, i32) {
    %c0_i32 = arith.constant 0 : i32
    %c0_i32_0 = arith.constant 0 : i32
    %c0_i32_1 = arith.constant 0 : i32
    return %c0_i32, %c0_i32_0 : i32, i32
  }
}

</mosaic_0001>

<bundles_post_ra>
// kernel: minilm_last_hidden_state.1
= control target key start
LH: loop header
LB: loop body
LE: loop exit
PB: predicated region body
PF: predicated region fallthrough
CT: control target
= control target key end

     0   :  { %s2183_s0 = inlined_call_operand.vmem [shape: f32[16,32], index: 0, kind: input, shape index: {}]   ;;  %s2184_s1 = inlined_call_operand.vmem [shape: f32[2,8], index: 1, kind: input, shape index: {}]   ;;  %s2185_s2 = inlined_call_operand.vmem [shape: bf16[2,32,96], index: 2, kind: input, shape index: {}]   ;;  %s2186_s3 = inlined_call_operand.vmem [shape: f32[2,1,96], index: 3, kind: input, shape index: {}]   ;;  %s2187_s4 = inlined_call_operand.vmem [shape: bf16[2,32,32], index: 4, kind: input, shape index: {}]   ;;  %s2188_s5 = inlined_call_operand.vmem [shape: f32[2,1,32], index: 5, kind: input, shape index: {}]   ;;  %s2189_s6 = inlined_call_operand.vmem [shape: f32[2,1,32], index: 6, kind: input, shape index: {}]   ;;  %s2190_s7 = inlined_call_operand.vmem [shape: f32[2,1,32], index: 7, kind: input, shape index: {}]   ;;  %s2191_s8 = inlined_call_operand.vmem [shape: bf16[2,32,64], index: 8, kind: input, shape index: {}]   ;;  %s2192_s9 = inlined_call_operand.vmem [shape: f32[2,1,64], index: 9, kind: input, shape index: {}]   ;;  %s2193_s10 = inlined_call_operand.vmem [shape: bf16[2,64,32], index: 10, kind: input, shape index: {}]   ;;  %s2194_s11 = inlined_call_operand.vmem [shape: f32[2,1,32], index: 11, kind: input, shape index: {}]   ;;  %s2195_s12 = inlined_call_operand.vmem [shape: f32[2,1,32], index: 12, kind: input, shape index: {}]   ;;  %s2196_s13 = inlined_call_operand.vmem [shape: f32[2,1,32], index: 13, kind: input, shape index: {}]   ;;  %s2197_s14 = inlined_call_operand.hbm [shape: f32[16,32], index: 14, kind: output, shape index: {}]  }
   0x1   :  { %2200 = sst [smem:[#allocation7_spill]] %s2183_s0 }
   0x2   :  { %2201 = sst [smem:[#allocation8_spill]] %s2184_s1 }
   0x3   :  { %2202 = sst [smem:[#allocation9_spill]] %s2185_s2 }
   0x4   :  { %2203 = sst [smem:[#allocation10_spill]] %s2186_s3 }
   0x5   :  { %2204 = sst [smem:[#allocation11_spill]] %s2187_s4 }
   0x6   :  { %2205 = sst [smem:[#allocation12_spill]] %s2197_s14 }
   0x7   :  { %19 = vsyncpa [#allocation4], 0  ;;  %s1911_s29 = smov 0  }
   0x8 LB: > { %2206 = sst [smem:[#allocation6_spill]] %s1817_s29  ;;  %s1917_s30 = sadd.s32 4294967295, %s1817_s29   ;;  %s1817_s29 = sphi %s1911_s29, %s25_s29  }
   0x9   : > { %p1606_p0 = scmp.ge.s32.totalorder %s1817_s29, 1  ;;  %p502_p1 = scmp.lt.s32.totalorder %s1817_s29, 3 }
   0xb   : > { %p503_p2 = pnand %p1606_p0, %p502_p1 }
   0xc   : > { %p582_p3 = scmp.lt.s32.totalorder (!%p503_p2), %s1917_s30, 1  ;;  %s2207_s3 = sld [smem:[#allocation10_spill]] (!%p503_p2) }
   0xd   : > { %506 = sbr.rel (%p503_p2) target bundleno = 2026 (0x7ea), region = 76  ;;  %s2208_s2 = sld [smem:[#allocation9_spill]] (!%p503_p2) }
   0xe   : > { %s2209_s4 = sld [smem:[#allocation11_spill]] (!%p503_p2)  ;;  %p1615_p4 = scmp.ne.s32.totalorder (!%p503_p2), %s1917_s30, 0 }
  0x12   : > { %s1923_s15 = scalar_select %p582_p3, %s1917_s30, 1 }
  0x13   : > { %s2210_s26 = sld [smem:[#allocation7_spill]] (!%p1615_p4) }
  0x14   : > { %s1680_s16 = sshll.u32 %s1923_s15, 4  ;;  %s589_s19 = scalar_lea.vmem %s2207_s3, %s1923_s15 }
  0x15   : > { %s586_s22 = scalar_lea.vmem %s2208_s2, %s1680_s16  ;;  %s1936_s25 = scalar_lea.vmem %s2209_s4, %s1680_s16 }
  0x16   : > { %s1953_s21 = scalar_lea.vmem %s2191_s8, %s1680_s16  ;;  %s611_s2 = scalar_lea.vmem %s2192_s9, %s1923_s15 }
  0x17   : > { %s1683_s4 = sshll.u32 %s1923_s15, 5  ;;  %s619_s0 = scalar_lea.vmem %s2194_s11, %s1923_s15 }
  0x18   : > { %s1963_s28 = scalar_lea.vmem %s2193_s10, %s1683_s4  ;;  %s622_s3 = scalar_lea.vmem %s2195_s12, %s1923_s15 }
  0x19   : > { %s625_s1 = scalar_lea.vmem %s2196_s13, %s1923_s15  ;;  %630 = sbr.rel (%p1615_p4) target bundleno = 33 (0x21), region = 80 }
  0x1e   : > { %v631_v0 = vld [vmem:[%s2210_s26] sm:$0xff]  ;;  %vm633_vm0 = vcmask 261120   ;;  %v632_v1 = vld [vmem:[%s2210_s26 + $0x8] sm:$0xff] }
  0x1f   : > { %634 = vst.msk [vmem:[#allocation3] sm:$0xff] %vm633_vm0, %v631_v0 }
  0x20   : > { %635 = vst.msk [vmem:[#allocation3 + $0x8] sm:$0xff] %vm633_vm0, %v632_v1 }
  0x21 PF: > { %v1685_v2 = vld [vmem:[%s586_s22 + $0x8] sm:$0xff]  ;;  %v1684_v3 = vld [vmem:[%s586_s22] sm:$0xff]  ;;  %vm659_vm1 = vcmask 261120   ;;  %s1819_s22 = smov 104   ;;  %s1820_s18 = smov 120   ;;  %vm686_vm2 = vcmask 64512  }
  0x22   : > { %669 = vmatpush.bf16.msra.mxu0 %v1685_v2  ;;  %v1725_v7 = vld [vmem:[%s589_s19] ss:$0 sm:$0xff]  ;;  %s1821_s14 = smov 96   ;;  %s1822_s29 = smov 80   ;;  %vm723_vm3 = vcmask 1043456   ;;  %vm801_vm4 = vcmask 130112  }
  0x23   : > { %s1823_s19 = smov 72   ;;  %s1824_s17 = smov 88   ;;  %vm863_vm5 = vcmask 195712   ;;  %vm925_vm6 = vcmask 261312   ;;  %vm1367_vm14 = vcmask 523264  }
  0x24   : > { %s1825_s16 = smov 112   ;;  %s1826_s20 = smov 56  }
  0x25   : > { %s2211_s4 = sld [smem:[#allocation8_spill]]  ;;  %s1827_s27 = smov 64  }
  0x26   : > { %v1984_v4 = vld [vmem:[#allocation3] sm:$0xff]  ;;  %670 = vmatpush.bf16.msra.mxu0 %v1684_v3  ;;  %s2213_s23 = scalar_lea.vmem %s2189_s6, %s1923_s15  ;;  %p1698_p5 = scmp.eq.s32.totalorder %s1917_s30, 1 }
  0x27   : > { %v1986_v5 = vld [vmem:[#allocation3 + $0x8] sm:$0xff] }
  0x28   : > { %v638_v6 = vpack.c.bf16 %v1986_v5, %v1984_v4 }
  0x2a   : > { %1624 = vmatmul.msk.bf16.vlgmr.msra.gmra.mxu0 %vm659_vm1, %v638_v6 }
  0x2b   : > { %v679_v40 = vld [vmem:[%s2211_s4] sm:$0x3] }
  0x2c   : > { %v680_v41 = vperm.slane %v679_v40, 0  ;;  %v927_v53 = vperm.slane %v679_v40, 1 }
  0xa7   : > { %v672_v8 = vpop.f32.mrf.mxu0 }
  0xa8   : > { %v673_v9 = vadd.f32 %v1725_v7, %v672_v8 }
  0xaa   : > { %v677_v10 = vpack.c.bf16 %v673_v9, %v673_v9 }
  0xac   : > { %v682_v11 = vunpack.c.l.b16 %v677_v10 }
  0xae   : > { %v1991_v12 = vpack.c.b16 %v682_v11, %v682_v11 }
  0xaf   : > { %v674_v13 = vpop.f32.mrf.mxu0 }
  0xb0   : > { %865 = vrot.lane.b32.xlu2 %v1991_v12, %s1819_s22  ;;  %741 = vrot.lane.b32.xlu1 %v1991_v12, %s1820_s18  ;;  %v675_v14 = vadd.f32 %v1725_v7, %v674_v13 }
  0xb1   : > { %684 = vrot.lane.b32.xlu0 %v1991_v12, %s1821_s14 }
  0xb2   : > { %v678_v15 = vpack.c.bf16 %v675_v14, %v675_v14 }
  0xb4   : > { %v929_v16 = vunpack.c.l.b16 %v678_v15 }
  0xb6   : > { %v1999_v17 = vpack.c.b16 %v929_v16, %v929_v16 }
  0xb8   : > { %805 = vrot.lane.b32.xlu2 %v1991_v12, %s1822_s29  ;;  %867 = vrot.lane.b32.xlu1 %v1991_v12, %s1823_s19 }
  0xb9   : > { %743 = vrot.lane.b32.xlu0 %v1991_v12, %s1824_s17 }
  0xc0   : > { %986 = vrot.lane.b32.xlu2 %v1999_v17, %s1820_s18  ;;  %803 = vrot.lane.b32.xlu1 %v1991_v12, %s1825_s16  ;;  %s1829_s18 = smov 40  }
  0xc1   : > { %988 = vrot.lane.b32.xlu0 %v1999_v17, %s1824_s17 }
  0xc8   : > { %1108 = vrot.lane.b32.xlu2 %v1999_v17, %s1819_s22  ;;  %1110 = vrot.lane.b32.xlu1 %v1999_v17, %s1823_s19  ;;  %s1828_s22 = smov 48   ;;  %s1832_s19 = smov 24  }
  0xc9   : > { %931 = vrot.lane.b32.xlu0 %v1999_v17, %s1821_s14  ;;  %s1830_s14 = smov 16  }
  0xd0   : > { %1047 = vrot.lane.b32.xlu1 %v1999_v17, %s1825_s16 }
  0xd1   : > { %1049 = vrot.lane.b32.xlu0 %v1999_v17, %s1822_s29  ;;  %s1831_s29 = smov 8  }
  0xd8   : > { %776 = vrot.lane.b32.xlu1 %v1991_v12, %s1826_s20 }
 0x10a   : > { %v866_v18 = vpop.permute.xlu2 %865 }
 0x112   : > { %v806_v19 = vpop.permute.xlu2 %805 }
 0x113   : > { %v811_v20 = vsel %vm686_vm2, %v806_v19, 0 }
 0x114   : > { %820 = vmatpush.bf16.xpose.msrb.mxu0 %v811_v20 }
 0x11a   : > { %v987_v37 = vpop.permute.xlu2 %986 }
 0x122   : > { %v742_v21 = vpop.permute.xlu1 %741  ;;  %v1109_v39 = vpop.permute.xlu2 %1108 }
 0x123   : > { %v685_v22 = vpop.permute.xlu0 %684 }
 0x124   : > { %v691_v23 = vsel %vm686_vm2, %v685_v22, 0 }
 0x125   : > { %700 = vmatpush.bf16.xpose.msra.mxu1 %v691_v23 }
 0x12a   : > { %v868_v24 = vpop.permute.xlu1 %867 }
 0x12b   : > { %v744_v25 = vpop.permute.xlu0 %743  ;;  %v873_v26 = vsel %vm686_vm2, %v868_v24, 0 }
 0x12c   : > { %1625 = vmatmul.msk.bf16.vlgmr.msra.gmra.mxu1 %vm686_vm2, %v677_v10  ;;  %v749_v27 = vsel %vm686_vm2, %v744_v25, 0 }
 0x12d   : > { %758 = vmatpush.bf16.xpose.msra.mxu3 %v749_v27 }
 0x132   : > { %v804_v28 = vpop.permute.xlu1 %803 }
 0x133   : > { %v989_v29 = vpop.permute.xlu0 %988  ;;  %1629 = vmatmul.msk.bf16.vlgmr.msrb.gmra.mxu0 %vm686_vm2, %v804_v28 }
 0x134   : > { %v994_v30 = vsel %vm686_vm2, %v989_v29, 0  ;;  %1627 = vmatmul.msk.bf16.vlgmr.msra.gmra.mxu3 %vm686_vm2, %v742_v21 }
 0x135   : > { %882 = vmatpush.bf16.xpose.msrb.mxu3 %v873_v26 }
 0x13a   : > { %v1111_v33 = vpop.permute.xlu1 %1110 }
 0x13b   : > { %v932_v31 = vpop.permute.xlu0 %931  ;;  %v1116_v35 = vsel %vm686_vm2, %v1111_v33, 0 }
 0x13c   : > { %v937_v32 = vsel %vm686_vm2, %v932_v31, 0 }
 0x13d   : > { %1003 = vmatpush.bf16.xpose.msra.mxu3 %v994_v30  ;;  %946 = vmatpush.bf16.xpose.msra.mxu0 %v937_v32 }
 0x142   : > { %v1048_v38 = vpop.permute.xlu1 %1047 }
 0x143   : > { %v1050_v34 = vpop.permute.xlu0 %1049 }
 0x144   : > { %v1055_v36 = vsel %vm686_vm2, %v1050_v34, 0  ;;  %1631 = vmatmul.msk.bf16.vlgmr.msrb.gmra.mxu3 %vm686_vm2, %v866_v18  ;;  %1633 = vmatmul.msk.bf16.vlgmr.msra.gmra.mxu0 %vm686_vm2, %v678_v15 }
 0x145   : > { %1125 = vmatpush.bf16.xpose.msrb.mxu3 %v1116_v35  ;;  %1064 = vmatpush.bf16.xpose.msrb.mxu0 %v1055_v36 }
 0x14a   : > { %v777_v24 = vpop.permute.xlu1 %776 }
 0x14b   : > { %v782_v29 = vsel %vm723_vm3, %v777_v24, 0 }
 0x154   : > { %1635 = vmatmul.msk.bf16.vlgmr.msra.gmra.mxu3 %vm686_vm2, %v987_v37  ;;  %1637 = vmatmul.msk.bf16.vlgmr.msrb.gmra.mxu0 %vm686_vm2, %v1048_v38 }
 0x164   : > { %1639 = vmatmul.msk.bf16.vlgmr.msrb.gmra.mxu3 %vm686_vm2, %v1109_v39 }
 0x1a9   : > { %v702_v42 = vpop.f32.mrf.mxu1 }
 0x1aa   : > { %v703_v43 = vadd.f32 %v702_v42, %v680_v41 }
 0x1ac   : > { %v706_v44 = vsel %vm686_vm2, %v703_v43, -inf }
 0x1ad   : > { %707 = vmax.xlane.f32.xlu2 %v706_v44 }
 0x1b0   : > { %v822_v45 = vpop.f32.mrf.mxu0 }
 0x1b1   : > { %v704_v46 = vpop.f32.mrf.mxu1  ;;  %v823_v47 = vadd.f32 %v822_v45, %v680_v41 }
 0x1b3   : > { %v826_v48 = vsel %vm686_vm2, %v823_v47, -inf }
 0x1b5   : > { %827 = vmax.xlane.f32.xlu2 %v826_v48 }
 0x1b7   : > { %v760_v49 = vpop.f32.mrf.mxu3 }
 0x1b8   : > { %v761_v50 = vadd.f32 %v760_v49, %v680_v41  ;;  %v824_v51 = vpop.f32.mrf.mxu0 }
 0x1ba   : > { %v764_v52 = vsel %vm686_vm2, %v761_v50, -inf }
 0x1bb   : > { %765 = vmax.xlane.f32.xlu0 %v764_v52 }
 0x1bf   : > { %v762_v54 = vpop.f32.mrf.mxu3 }
 0x1c1   : > { %v948_v55 = vpop.f32.mrf.mxu0 }
 0x1c2   : > { %v2033_v56 = vadd.f32 %v948_v55, %v927_v53 }
 0x1c4   : > { %v952_v57 = vsel %vm686_vm2, %v2033_v56, -inf }
 0x1c5   : > { %953 = vmax.xlane.f32.xlu1 %v952_v57 }
 0x1c7   : > { %v884_v58 = vpop.f32.mrf.mxu3 }
 0x1c8   : > { %v2037_v59 = vadd.f32 %v884_v58, %v680_v41 }
 0x1c9   : > { %v950_v60 = vpop.f32.mrf.mxu0 }
 0x1ca   : > { %v888_v61 = vsel %vm686_vm2, %v2037_v59, -inf }
 0x1cd   : > { %718 = vrot.lane.b32.xlu2 %v1991_v12, %s1827_s27  ;;  %889 = vmax.xlane.f32.xlu1 %v888_v61 }
 0x1cf   : > { %v886_v62 = vpop.f32.mrf.mxu3 }
 0x1d1   : > { %v1066_v63 = vpop.f32.mrf.mxu0 }
 0x1d2   : > { %v1067_v0 = vadd.f32 %v1066_v63, %v927_v53 }
 0x1d4   : > { %v1070_v1 = vsel %vm686_vm2, %v1067_v0, -inf }
 0x1d5   : > { %1071 = vmax.xlane.f32.xlu0 %v1070_v1 }
 0x1d7   : > { %v1005_v2 = vpop.f32.mrf.mxu3 }
 0x1d8   : > { %v1006_v11 = vadd.f32 %v1005_v2, %v927_v53 }
 0x1d9   : > { %v1068_v3 = vpop.f32.mrf.mxu0 }
 0x1da   : > { %v1009_v13 = vsel %vm686_vm2, %v1006_v11, -inf }
 0x1df   : > { %v1007_v6 = vpop.f32.mrf.mxu3 }
 0x1e6   : > { %838 = vrot.lane.b32.xlu1 %v1991_v12, %s1828_s22 }
 0x1e7   : > { %v1127_v7 = vpop.f32.mrf.mxu3 }
 0x1e8   : > { %v1128_v8 = vadd.f32 %v1127_v7, %v927_v53 }
 0x1ea   : > { %v1131_v9 = vsel %vm686_vm2, %v1128_v8, -inf }
 0x1eb   : > { %1132 = vmax.xlane.f32.xlu0 %v1131_v9 }
 0x1ef   : > { %v1129_v10 = vpop.f32.mrf.mxu3 }
 0x1f6   : > { %1010 = vmax.xlane.f32.xlu2 %v1009_v13 }
 0x220   : > { %v708_v14 = vpop.xlane.xlu2 %707 }
 0x221   : > { %v709_v15 = vsub.f32 %v703_v43, %v708_v14 }
 0x223   : > { %v710_v16 = vmul.f32 1.442695, %v709_v15 }
 0x225   : > { %1733 = vpow2.f32 %v710_v16 }
 0x228   : > { %v828_v18 = vpop.xlane.xlu2 %827 }
 0x229   : > { %v829_v19 = vsub.f32 %v823_v47, %v828_v18 }
 0x22b   : > { %v2048_v20 = vpop.eup %1733  ;;  %v830_v21 = vmul.f32 1.442695, %v829_v19 }
 0x22c   : > { %v712_v22 = vsel %vm686_vm2, %v2048_v20, 0.0 }
 0x22d   : > { %1735 = vpow2.f32 %v830_v21  ;;  %713 = vadd.xlane.f32.xlu0 %v712_v22 }
 0x22e   : > { %v766_v23 = vpop.xlane.xlu0 %765 }
 0x22f   : > { %v767_v25 = vsub.f32 %v761_v50, %v766_v23 }
 0x230   : > { %v719_v26 = vpop.permute.xlu2 %718 }
 0x231   : > { %v768_v27 = vmul.f32 1.442695, %v767_v25  ;;  %v725_v28 = vsel %vm723_vm3, %v719_v26, 0 }
 0x232   : > { %734 = vmatpush.bf16.msra.mxu2 %v725_v28 }
 0x233   : > { %v2054_v30 = vpop.eup %1735  ;;  %1737 = vpow2.f32 %v768_v27 }
 0x234   : > { %v832_v31 = vsel %vm686_vm2, %v2054_v30, 0.0 }
 0x235   : > { %833 = vadd.xlane.f32.xlu2 %v832_v31 }
 0x236   : > { %791 = vmatpush.bf16.msrb.mxu2 %v782_v29 }
 0x238   : > { %v954_v34 = vpop.xlane.xlu1 %953 }
 0x239   : > { %v2058_v32 = vpop.eup %1737  ;;  %v955_v37 = vsub.f32 %v2033_v56, %v954_v34 }
 0x23a   : > { %v770_v33 = vsel %vm686_vm2, %v2058_v32, 0.0 }
 0x23b   : > { %771 = vadd.xlane.f32.xlu1 %v770_v33  ;;  %v956_v39 = vmul.f32 1.442695, %v955_v37 }
 0x23d   : > { %1739 = vpow2.f32 %v956_v39 }
 0x240   : > { %v890_v35 = vpop.xlane.xlu1 %889 }
 0x241   : > { %900 = vrot.lane.b32.xlu0 %v1991_v12, %s1829_s18  ;;  %v891_v41 = vsub.f32 %v2037_v59, %v890_v35 }
 0x243   : > { %v892_v42 = vmul.f32 1.442695, %v891_v41  ;;  %v1740_v44 = vpop.eup %1739 }
 0x244   : > { %v958_v48 = vsel %vm686_vm2, %v1740_v44, 0.0 }
 0x245   : > { %1741 = vpow2.f32 %v892_v42 }
 0x248   : > { %v1072_v40 = vpop.xlane.xlu0 %1071 }
 0x249   : > { %v1073_v12 = vsub.f32 %v1067_v0, %v1072_v40 }
 0x24b   : > { %v1074_v45 = vmul.f32 1.442695, %v1073_v12  ;;  %v1742_v51 = vpop.eup %1741 }
 0x24c   : > { %v894_v54 = vsel %vm686_vm2, %v1742_v51, 0.0 }
 0x24d   : > { %1021 = vrot.lane.b32.xlu2 %v1999_v17, %s1826_s20  ;;  %1743 = vpow2.f32 %v1074_v45  ;;  %s2212_s20 = scalar_lea.vmem %s2188_s5, %s1923_s15 }
 0x253   : > { %v2072_v53 = vpop.eup %1743 }
 0x254   : > { %964 = vrot.lane.b32.xlu1 %v1999_v17, %s1827_s27  ;;  %v1076_v55 = vsel %vm686_vm2, %v2072_v53, 0.0  ;;  %s2214_s27 = scalar_lea.vmem %s2190_s7, %s1923_s15  ;;  %s2215_s15 = sld [smem:[#allocation12_spill]] }
 0x258   : > { %v839_v36 = vpop.permute.xlu1 %838 }
 0x259   : > { %v844_v38 = vsel %vm723_vm3, %v839_v36, 0 }
 0x25a   : > { %853 = vmatpush.bf16.msrb.mxu1 %v844_v38 }
 0x25e   : > { %v1133_v43 = vpop.xlane.xlu0 %1132 }
 0x25f   : > { %v1134_v46 = vsub.f32 %v1128_v8, %v1133_v43 }
 0x261   : > { %v1135_v50 = vmul.f32 1.442695, %v1134_v46 }
 0x263   : > { %1745 = vpow2.f32 %v1135_v50 }
 0x269   : > { %v1011_v47 = vpop.xlane.xlu2 %1010  ;;  %v2077_v56 = vpop.eup %1745 }
 0x26a   : > { %v1012_v49 = vsub.f32 %v1006_v11, %v1011_v47  ;;  %v1137_v58 = vsel %vm686_vm2, %v2077_v56, 0.0 }
 0x26b   : > { %959 = vadd.xlane.f32.xlu0 %v958_v48 }
 0x26c   : > { %v1013_v52 = vmul.f32 1.442695, %v1012_v49 }
 0x26e   : > { %1747 = vpow2.f32 %v1013_v52 }
 0x273   : > { %895 = vadd.xlane.f32.xlu0 %v894_v54 }
 0x274   : > { %v1748_v57 = vpop.eup %1747 }
 0x275   : > { %v1015_v59 = vsel %vm686_vm2, %v1748_v57, 0.0 }
 0x276   : > { %1077 = vadd.xlane.f32.xlu2 %v1076_v55 }
 0x27b   : > { %1138 = vadd.xlane.f32.xlu0 %v1137_v58 }
 0x27e   : > { %1016 = vadd.xlane.f32.xlu1 %v1015_v59  ;;  %v1687_v59 = vld [vmem:[%s1936_s25 + $0x8] sm:$0xff] }
 0x27f   : > { %1201 = vmatpush.bf16.msra.mxu0 %v1687_v59 }
 0x28f   : > { %1143 = vrot.lane.b32.xlu0 %v1999_v17, %s1829_s18 }
 0x297   : > { %1082 = vrot.lane.b32.xlu1 %v1999_v17, %s1828_s22 }
 0x2a0   : > { %v714_v60 = vpop.xlane.xlu0 %713 }
 0x2a1   : > { %1749 = vrcp.f32 %v714_v60  ;;  %v1686_v60 = vld [vmem:[%s1936_s25] sm:$0xff] }
 0x2a2   : > { %1202 = vmatpush.bf16.msra.mxu0 %v1686_v60  ;;  %v1693_v60 = vld [vmem:[%s1963_s28 + $0x18] sm:$0xff] }
 0x2a3   : > { %1375 = vmatpush.bf16.msra.mxu3 %v1693_v60  ;;  %v1732_v60 = vld [vmem:[%s625_s1] ss:$0 sm:$0xff]  ;;  %s1452_s1 = sshll.u32 %s2215_s15, 4  ;;  %s1453_s1 = int_to_ptr.hbm [resolvable:$true] %s1452_s1 }
 0x2a7   : > { %v1750_v61 = vpop.eup %1749 }
 0x2a8   : > { %v834_v62 = vpop.xlane.xlu2 %833  ;;  %v716_v63 = vmul.f32 %v1750_v61, %v2048_v20 }
 0x2a9   : > { %1751 = vrcp.f32 %v834_v62 }
 0x2aa   : > { %v717_v0 = vpack.c.bf16 %v716_v63, %v716_v63 }
 0x2ac   : > { %1626 = vmatmul.msk.bf16.vlgmr.msra.gmra.mxu2 %vm686_vm2, %v717_v0 }
 0x2ae   : > { %v772_v1 = vpop.xlane.xlu1 %771 }
 0x2af   : > { %v1752_v2 = vpop.eup %1751  ;;  %1753 = vrcp.f32 %v772_v1 }
 0x2b0   : > { %v836_v3 = vmul.f32 %v1752_v2, %v2054_v30  ;;  %v1022_v10 = vpop.permute.xlu2 %1021 }
 0x2b1   : > { %v1027_v13 = vsel %vm723_vm3, %v1022_v10, 0 }
 0x2b2   : > { %v837_v6 = vpack.c.bf16 %v836_v3, %v836_v3  ;;  %v1726_v3 = vld [vmem:[%s2212_s20] ss:$0 sm:$0xff] }
 0x2b3   : > { %v901_v7 = vpop.permute.xlu0 %900 }
 0x2b4   : > { %v906_v8 = vsel %vm723_vm3, %v901_v7, 0  ;;  %1630 = vmatmul.msk.bf16.vlgmr.msrb.gmra.mxu1 %vm686_vm2, %v837_v6 }
 0x2b5   : > { %v1754_v17 = vpop.eup %1753  ;;  %915 = vmatpush.bf16.msra.mxu2 %v906_v8 }
 0x2b6   : > { %v774_v9 = vmul.f32 %v1754_v17, %v2058_v32 }
 0x2b8   : > { %v775_v11 = vpack.c.bf16 %v774_v9, %v774_v9 }
 0x2bc   : > { %1628 = vmatmul.msk.bf16.vlgmr.msrb.gmra.mxu2 %vm686_vm2, %v775_v11 }
 0x2bd   : > { %1036 = vmatpush.bf16.msrb.mxu2 %v1027_v13 }
 0x2c6   : > { %v965_v14 = vpop.permute.xlu1 %964 }
 0x2c7   : > { %v970_v15 = vsel %vm723_vm3, %v965_v14, 0  ;;  %v1833_v14 = vmov 32.0  }
 0x2c8   : > { %979 = vmatpush.bf16.msra.mxu1 %v970_v15 }
 0x2de   : > { %v960_v16 = vpop.xlane.xlu0 %959 }
 0x2df   : > { %1755 = vrcp.f32 %v960_v16 }
 0x2e5   : > { %v1756_v18 = vpop.eup %1755 }
 0x2e6   : > { %v962_v19 = vmul.f32 %v1756_v18, %v1740_v44  ;;  %v896_v20 = vpop.xlane.xlu0 %895 }
 0x2e7   : > { %1757 = vrcp.f32 %v896_v20 }
 0x2e8   : > { %v963_v21 = vpack.c.bf16 %v962_v19, %v962_v19 }
 0x2e9   : > { %v1078_v28 = vpop.xlane.xlu2 %1077 }
 0x2ea   : > { %1634 = vmatmul.msk.bf16.vlgmr.msra.gmra.mxu1 %vm686_vm2, %v963_v21 }
 0x2ed   : > { %v1758_v22 = vpop.eup %1757 }
 0x2ee   : > { %v898_v23 = vmul.f32 %v1758_v22, %v1742_v51  ;;  %v1139_v27 = vpop.xlane.xlu0 %1138 }
 0x2f0   : > { %v899_v24 = vpack.c.bf16 %v898_v23, %v898_v23 }
 0x2f1   : > { %v1017_v25 = vpop.xlane.xlu1 %1016 }
 0x2f2   : > { %1632 = vmatmul.msk.bf16.vlgmr.msra.gmra.mxu2 %vm686_vm2, %v899_v24  ;;  %1759 = vrcp.f32 %v1017_v25 }
 0x2f3   : > { %1761 = vrcp.f32 %v1078_v28 }
 0x2f4   : > { %1763 = vrcp.f32 %v1139_v27 }
 0x2f5   : > { %1765 = vrcp.f32 %v1833_v14 }
 0x2f8   : > { %v1760_v26 = vpop.eup %1759 }
 0x2f9   : > { %v1019_v29 = vmul.f32 %v1760_v26, %v1748_v57  ;;  %v1762_v33 = vpop.eup %1761 }
 0x2fa   : > { %v1080_v34 = vmul.f32 %v1762_v33, %v2072_v53  ;;  %v1764_v35 = vpop.eup %1763 }
 0x2fb   : > { %v1020_v30 = vpack.c.bf16 %v1019_v29, %v1019_v29  ;;  %v1141_v39 = vmul.f32 %v1764_v35, %v2077_v56  ;;  %v1766_v15 = vpop.eup %1765 }
 0x2fc   : > { %v1081_v38 = vpack.c.bf16 %v1080_v34, %v1080_v34  ;;  %v1220_v16 = vmul.f32 32.0, %v1766_v15  ;;  %vm1224_vm7 = vweird.f32 %v1766_v15  ;;  %v1688_v34 = vld [vmem:[%s1953_s21] sm:$0xff] }
 0x2fd   : > { %v1142_v40 = vpack.c.bf16 %v1141_v39, %v1141_v39 }
 0x2fe   : > { %v1221_v18 = vsub.f32 1.0, %v1220_v16 }
 0x300   : > { %v1222_v19 = vmul.f32 %v1766_v15, %v1221_v18 }
 0x301   : > { %v1144_v31 = vpop.permute.xlu0 %1143 }
 0x302   : > { %v1149_v32 = vsel %vm723_vm3, %v1144_v31, 0  ;;  %1636 = vmatmul.msk.bf16.vlgmr.msrb.gmra.mxu2 %vm686_vm2, %v1020_v30  ;;  %v1223_v20 = vadd.f32 %v1766_v15, %v1222_v19  ;;  %v1689_v30 = vld [vmem:[%s1953_s21 + $0x8] sm:$0xff]  ;;  %s1835_s21 = smov 128  }
 0x303   : > { %1158 = vmatpush.bf16.msra.mxu2 %v1149_v32 }
 0x309   : > { %v1083_v36 = vpop.permute.xlu1 %1082 }
 0x30a   : > { %v1088_v37 = vsel %vm723_vm3, %v1083_v36, 0 }
 0x30b   : > { %1097 = vmatpush.bf16.msrb.mxu1 %v1088_v37 }
 0x30e   : > { %1638 = vmatmul.msk.bf16.vlgmr.msrb.gmra.mxu1 %vm686_vm2, %v1081_v38 }
 0x30f   : > { %1304 = vmatpush.bf16.msra.mxu1 %v1689_v30 }
 0x312   : > { %1640 = vmatmul.msk.bf16.vlgmr.msra.gmra.mxu2 %vm686_vm2, %v1142_v40 }
 0x313   : > { %1305 = vmatpush.bf16.msra.mxu1 %v1688_v34 }
 0x32f   : > { %v736_v41 = vpop.f32.mrf.mxu2 }
 0x330   : > { %740 = vst.msk [vmem:[#allocation2] sm:$0xff] %vm686_vm2, %v736_v41 }
 0x331   : > { %v855_v12 = vpop.f32.mrf.mxu1 }
 0x332   : > { %860 = vrot.lane.b32.xlu0 %v855_v12, %s1830_s14 }
 0x337   : > { %v738_v42 = vpop.f32.mrf.mxu2 }
 0x339   : > { %v857_v43 = vpop.f32.mrf.mxu1 }
 0x33f   : > { %v793_v44 = vpop.f32.mrf.mxu2 }
 0x340   : > { %798 = vrot.lane.b32.xlu0 %v793_v44, %s1831_s29 }
 0x347   : > { %v795_v45 = vpop.f32.mrf.mxu2 }
 0x367   : > { %v981_v46 = vpop.f32.mrf.mxu1 }
 0x368   : > { %985 = vst.msk [vmem:[#allocation2 + $0x8] sm:$0xff] %vm686_vm2, %v981_v46 }
 0x36f   : > { %v983_v47 = vpop.f32.mrf.mxu1 }
 0x375   : > { %v917_v48 = vpop.f32.mrf.mxu2 }
 0x376   : > { %922 = vrot.lane.b32.xlu2 %v917_v48, %s1832_s19 }
 0x37d   : > { %v919_v49 = vpop.f32.mrf.mxu2 }
 0x37e   : > { %v1727_v49 = vld [vmem:[%s2213_s23] ss:$0 sm:$0xff] }
 0x385   : > { %v1038_v50 = vpop.f32.mrf.mxu2 }
 0x386   : > { %1043 = vrot.lane.b32.xlu1 %v1038_v50, %s1831_s29 }
 0x38b   : > { %v1099_v51 = vpop.f32.mrf.mxu1 }
 0x38d   : > { %v1040_v52 = vpop.f32.mrf.mxu2 }
 0x38e   : > { %1104 = vrot.lane.b32.xlu1 %v1099_v51, %s1830_s14 }
 0x393   : > { %v1101_v53 = vpop.f32.mrf.mxu1 }
 0x394   : > { %v1728_v53 = vld [vmem:[%s2214_s27] ss:$0 sm:$0xff] }
 0x395   : > { %v1160_v54 = vpop.f32.mrf.mxu2 }
 0x396   : > { %1165 = vrot.lane.b32.xlu0 %v1160_v54, %s1832_s19 }
 0x39d   : > { %v1162_v55 = vpop.f32.mrf.mxu2 }
 0x3a4   : > { %v861_v56 = vpop.permute.xlu0 %860 }
 0x3b2   : > { %v799_v57 = vpop.permute.xlu0 %798 }
 0x3b3   : > { %802 = vst.msk [vmem:[#allocation2] sm:$0xff] %vm801_vm4, %v799_v57 }
 0x3b4   : > { %864 = vst.msk [vmem:[#allocation2] sm:$0xff] %vm863_vm5, %v861_v56 }
 0x3d0   : > { %v923_v58 = vpop.permute.xlu2 %922 }
 0x3d1   : > { %926 = vst.msk [vmem:[#allocation2] sm:$0xff] %vm925_vm6, %v923_v58 }
 0x3d8   : > { %v1169_v0 = vld [vmem:[#allocation2] sm:$0xff] }
 0x3f8   : > { %v1044_v61 = vpop.permute.xlu1 %1043 }
 0x3f9   : > { %1046 = vst.msk [vmem:[#allocation2 + $0x8] sm:$0xff] %vm801_vm4, %v1044_v61  ;;  %v1692_v61 = vld [vmem:[%s1963_s28 + $0x10] sm:$0xff] }
 0x3fa   : > { %1376 = vmatpush.bf16.msra.mxu3 %v1692_v61 }
 0x400   : > { %v1105_v62 = vpop.permute.xlu1 %1104 }
 0x401   : > { %1107 = vst.msk [vmem:[#allocation2 + $0x8] sm:$0xff] %vm863_vm5, %v1105_v62  ;;  %v1691_v62 = vld [vmem:[%s1963_s28 + $0x8] sm:$0xff] }
 0x402   : > { %1377 = vmatpush.bf16.msra.mxu3 %v1691_v62 }
 0x408   : > { %v1166_v63 = vpop.permute.xlu0 %1165 }
 0x409   : > { %1168 = vst.msk [vmem:[#allocation2 + $0x8] sm:$0xff] %vm925_vm6, %v1166_v63  ;;  %v1690_v63 = vld [vmem:[%s1963_s28] sm:$0xff] }
 0x40a   : > { %1378 = vmatpush.bf16.msra.mxu3 %v1690_v63 }
 0x410   : > { %v1170_v1 = vld [vmem:[#allocation2 + $0x8] sm:$0xff] }
 0x411   : > { %v1171_v2 = vpack.c.bf16 %v1170_v1, %v1169_v0  ;;  %v1729_v0 = vld [vmem:[%s611_s2] ss:$0 sm:$0xff] }
 0x413   : > { %1649 = vmatmul.msk.bf16.vlgmr.msra.gmra.mxu0 %vm659_vm1, %v1171_v2 }
 0x490   : > { %v1204_v6 = vpop.f32.mrf.mxu0 }
 0x491   : > { %v1205_v7 = vadd.f32 %v1726_v3, %v1204_v6 }
 0x493   : > { %v1209_v8 = vadd.f32 %v1205_v7, %v1984_v4  ;;  %v2120_v4 = vsel %vm1224_vm7, %v1766_v15, %v1223_v20 }
 0x495   : > { %v1213_v17 = vsel %vm659_vm1, %v1209_v8, 0.0 }
 0x496   : > { %1214 = vadd.xlane.f32.xlu1 %v1213_v17 }
 0x498   : > { %v1206_v9 = vpop.f32.mrf.mxu0 }
 0x499   : > { %v1207_v10 = vadd.f32 %v1726_v3, %v1206_v9 }
 0x49b   : > { %v1210_v11 = vadd.f32 %v1207_v10, %v1986_v5 }
 0x49d   : > { %v1216_v13 = vsel %vm659_vm1, %v1210_v11, 0.0 }
 0x49e   : > { %1217 = vadd.xlane.f32.xlu0 %v1216_v13 }
 0x509   : > { %v1215_v21 = vpop.xlane.xlu1 %1214 }
 0x50a   : > { %v1226_v22 = vmul.f32 %v2120_v4, %v1215_v21 }
 0x50c   : > { %v1228_v23 = vsub.f32 %v1209_v8, %v1226_v22 }
 0x50e   : > { %v1230_v5 = vmul.f32 %v1228_v23, %v1228_v23 }
 0x510   : > { %v1232_v24 = vsel %vm659_vm1, %v1230_v5, 0.0 }
 0x511   : > { %v1218_v25 = vpop.xlane.xlu0 %1217  ;;  %1233 = vadd.xlane.f32.xlu2 %v1232_v24 }
 0x512   : > { %v1227_v26 = vmul.f32 %v2120_v4, %v1218_v25 }
 0x514   : > { %v1229_v27 = vsub.f32 %v1210_v11, %v1227_v26  ;;  %v1730_v26 = vld [vmem:[%s619_s0] ss:$0 sm:$0xff] }
 0x516   : > { %v1231_v28 = vmul.f32 %v1229_v27, %v1229_v27 }
 0x518   : > { %v1235_v29 = vsel %vm659_vm1, %v1231_v28, 0.0 }
 0x519   : > { %1236 = vadd.xlane.f32.xlu1 %v1235_v29 }
 0x584   : > { %v1234_v31 = vpop.xlane.xlu2 %1233 }
 0x585   : > { %v1238_v32 = vmul.f32 %v1234_v31, %v2120_v4 }
 0x587   : > { %v1240_v33 = vadd.f32 1e-12, %v1238_v32 }
 0x589   : > { %1767 = vrsqrt.f32 %v1240_v33  ;;  %vm1248_vm9 = vweird.f32 %v1240_v33 }
 0x58c   : > { %v1237_v35 = vpop.xlane.xlu1 %1236 }
 0x58d   : > { %v1239_v36 = vmul.f32 %v1237_v35, %v2120_v4 }
 0x58f   : > { %v1768_v37 = vpop.eup %1767  ;;  %v1241_v38 = vadd.f32 1e-12, %v1239_v36 }
 0x590   : > { %v1243_v39 = vmul.f32 %v1768_v37, %v1240_v33  ;;  %vm1249_vm8 = vweird.f32 %v1768_v37 }
 0x591   : > { %1769 = vrsqrt.f32 %v1241_v38  ;;  %vm1250_vm10 = vmor %vm1248_vm9, %vm1249_vm8  ;;  %vm1258_vm12 = vweird.f32 %v1241_v38 }
 0x592   : > { %v1244_v40 = vmul.f32 %v1768_v37, %v1243_v39 }
 0x594   : > { %v1245_v41 = vmul.f32 0.5, %v1244_v40 }
 0x596   : > { %v1246_v12 = vsub.f32 1.5, %v1245_v41 }
 0x597   : > { %v1770_v42 = vpop.eup %1769 }
 0x598   : > { %v1247_v43 = vmul.f32 %v1768_v37, %v1246_v12  ;;  %v1253_v44 = vmul.f32 %v1770_v42, %v1241_v38  ;;  %vm1259_vm11 = vweird.f32 %v1770_v42 }
 0x599   : > { %vm1260_vm13 = vmor %vm1258_vm12, %vm1259_vm11 }
 0x59a   : > { %v1254_v45 = vmul.f32 %v1770_v42, %v1253_v44  ;;  %v1251_v46 = vsel %vm1250_vm10, %v1768_v37, %v1247_v43 }
 0x59b   : > { %v1262_v50 = vmul.f32 %v1251_v46, %v1228_v23 }
 0x59c   : > { %v1255_v47 = vmul.f32 0.5, %v1254_v45 }
 0x59d   : > { %v1267_v54 = vmul.f32 %v1727_v49, %v1262_v50 }
 0x59e   : > { %v1256_v48 = vsub.f32 1.5, %v1255_v47 }
 0x59f   : > { %v1272_v57 = vadd.f32 %v1728_v53, %v1267_v54 }
 0x5a0   : > { %v1257_v51 = vmul.f32 %v1770_v42, %v1256_v48 }
 0x5a2   : > { %v1261_v52 = vsel %vm1260_vm13, %v1770_v42, %v1257_v51 }
 0x5a3   : > { %v1263_v55 = vmul.f32 %v1261_v52, %v1229_v27 }
 0x5a5   : > { %v1268_v56 = vmul.f32 %v1727_v49, %v1263_v55 }
 0x5a7   : > { %v1273_v58 = vadd.f32 %v1728_v53, %v1268_v56 }
 0x5a9   : > { %v1274_v59 = vpack.c.bf16 %v1273_v58, %v1272_v57 }
 0x5ab   : > { %1658 = vmatmul.msk.bf16.vlgmr.msra.gmra.mxu1 %vm659_vm1, %v1274_v59 }
 0x628   : > { %v1307_v1 = vpop.f32.mrf.mxu1 }
 0x629   : > { %v1308_v2 = vadd.f32 %v1729_v0, %v1307_v1 }
 0x62b   : > { %v1314_v3 = vmul.f32 0.044715, %v1308_v2  ;;  %v1312_v21 = vmul.f32 0.5, %v1308_v2 }
 0x62d   : > { %v1316_v6 = vmul.f32 %v1314_v3, %v1308_v2 }
 0x62f   : > { %v1318_v7 = vmul.f32 %v1316_v6, %v1308_v2 }
 0x630   : > { %v1309_v8 = vpop.f32.mrf.mxu1 }
 0x631   : > { %v1320_v17 = vadd.f32 %v1318_v7, %v1308_v2  ;;  %v1310_v9 = vadd.f32 %v1729_v0, %v1309_v8 }
 0x633   : > { %v1315_v10 = vmul.f32 0.044715, %v1310_v9  ;;  %v1322_v11 = vmul.f32 0.7978846, %v1320_v17  ;;  %v1313_v22 = vmul.f32 0.5, %v1310_v9 }
 0x635   : > { %v1317_v13 = vmul.f32 %v1315_v10, %v1310_v9  ;;  %1771 = vtanh.f32 %v1322_v11 }
 0x637   : > { %v1319_v14 = vmul.f32 %v1317_v13, %v1310_v9 }
 0x639   : > { %v1321_v15 = vadd.f32 %v1319_v14, %v1310_v9 }
 0x63b   : > { %v1323_v16 = vmul.f32 0.7978846, %v1321_v15  ;;  %v1772_v18 = vpop.eup %1771 }
 0x63c   : > { %v1326_v19 = vadd.f32 1.0, %v1772_v18 }
 0x63d   : > { %1773 = vtanh.f32 %v1323_v16 }
 0x63e   : > { %v1328_v5 = vmul.f32 %v1326_v19, %v1312_v21 }
 0x643   : > { %v1774_v20 = vpop.eup %1773 }
 0x644   : > { %v1327_v23 = vadd.f32 1.0, %v1774_v20 }
 0x646   : > { %v1329_v24 = vmul.f32 %v1327_v23, %v1313_v22 }
 0x648   : > { %v1330_v25 = vpack.c.bf16 %v1329_v24, %v1328_v5 }
 0x64a   : > { %1675 = vmatmul.msk.bf16.vlgmr.msra.gmra.mxu3 %vm1367_vm14, %v1330_v25 }
 0x6cd   : > { %v1380_v27 = vpop.f32.mrf.mxu3 }
 0x6ce   : > { %v1381_v28 = vadd.f32 %v1730_v26, %v1380_v27 }
 0x6d0   : > { %v1385_v29 = vadd.f32 %v1381_v28, %v1272_v57 }
 0x6d2   : > { %v1389_v30 = vsel %vm659_vm1, %v1385_v29, 0.0 }
 0x6d3   : > { %1390 = vadd.xlane.f32.xlu0 %v1389_v30 }
 0x6d5   : > { %v1382_v31 = vpop.f32.mrf.mxu3 }
 0x6d6   : > { %v1383_v32 = vadd.f32 %v1730_v26, %v1382_v31 }
 0x6d8   : > { %v1386_v33 = vadd.f32 %v1383_v32, %v1273_v58  ;;  %v1731_v58 = vld [vmem:[%s622_s3] ss:$0 sm:$0xff]  ;;  %s1834_s3 = smov [#allocation3]  }
 0x6d9   : > { %s1450_s16 = sshll.u32 %s1834_s3, 4  ;;  %s1451_s16 = int_to_ptr.vmem [resolvable:$true] %s1450_s16 }
 0x6da   : > { %v1392_v34 = vsel %vm659_vm1, %v1386_v33, 0.0 }
 0x6db   : > { %1393 = vadd.xlane.f32.xlu1 %v1392_v34 }
 0x746   : > { %v1391_v35 = vpop.xlane.xlu0 %1390 }
 0x747   : > { %v1395_v36 = vmul.f32 %v1391_v35, %v2120_v4 }
 0x749   : > { %v1397_v37 = vsub.f32 %v1385_v29, %v1395_v36 }
 0x74b   : > { %v1399_v38 = vmul.f32 %v1397_v37, %v1397_v37 }
 0x74d   : > { %v1401_v39 = vsel %vm659_vm1, %v1399_v38, 0.0 }
 0x74e   : > { %v1394_v40 = vpop.xlane.xlu1 %1393  ;;  %1402 = vadd.xlane.f32.xlu0 %v1401_v39 }
 0x74f   : > { %v1396_v41 = vmul.f32 %v1394_v40, %v2120_v4 }
 0x751   : > { %v1398_v12 = vsub.f32 %v1386_v33, %v1396_v41 }
 0x753   : > { %v1400_v42 = vmul.f32 %v1398_v12, %v1398_v12 }
 0x755   : > { %v1404_v43 = vsel %vm659_vm1, %v1400_v42, 0.0 }
 0x756   : > { %1405 = vadd.xlane.f32.xlu1 %v1404_v43 }
 0x7c1   : > { %v1403_v44 = vpop.xlane.xlu0 %1402 }
 0x7c2   : > { %v1407_v45 = vmul.f32 %v1403_v44, %v2120_v4 }
 0x7c4   : > { %v1409_v46 = vadd.f32 1e-12, %v1407_v45 }
 0x7c6   : > { %1775 = vrsqrt.f32 %v1409_v46  ;;  %vm1417_vm0 = vweird.f32 %v1409_v46 }
 0x7c9   : > { %v1406_v47 = vpop.xlane.xlu1 %1405 }
 0x7ca   : > { %v1408_v48 = vmul.f32 %v1406_v47, %v2120_v4 }
 0x7cc   : > { %v1776_v49 = vpop.eup %1775  ;;  %v1410_v50 = vadd.f32 1e-12, %v1408_v48 }
 0x7cd   : > { %v1412_v51 = vmul.f32 %v1776_v49, %v1409_v46  ;;  %vm1418_vm15 = vweird.f32 %v1776_v49 }
 0x7ce   : > { %1777 = vrsqrt.f32 %v1410_v50  ;;  %vm1419_vm2 = vmor %vm1417_vm0, %vm1418_vm15  ;;  %vm1427_vm4 = vweird.f32 %v1410_v50 }
 0x7cf   : > { %v1413_v52 = vmul.f32 %v1776_v49, %v1412_v51 }
 0x7d1   : > { %v1414_v53 = vmul.f32 0.5, %v1413_v52 }
 0x7d3   : > { %v1415_v54 = vsub.f32 1.5, %v1414_v53 }
 0x7d4   : > { %v1778_v55 = vpop.eup %1777 }
 0x7d5   : > { %v1416_v56 = vmul.f32 %v1776_v49, %v1415_v54  ;;  %v1422_v57 = vmul.f32 %v1778_v55, %v1410_v50  ;;  %vm1428_vm3 = vweird.f32 %v1778_v55 }
 0x7d6   : > { %vm1429_vm5 = vmor %vm1427_vm4, %vm1428_vm3 }
 0x7d7   : > { %v1420_v4 = vsel %vm1419_vm2, %v1776_v49, %v1416_v56  ;;  %v1423_v59 = vmul.f32 %v1778_v55, %v1422_v57 }
 0x7d8   : > { %v1431_v61 = vmul.f32 %v1420_v4, %v1397_v37 }
 0x7d9   : > { %v1424_v62 = vmul.f32 0.5, %v1423_v59 }
 0x7da   : > { %v1436_v63 = vmul.f32 %v1731_v58, %v1431_v61 }
 0x7db   : > { %v1425_v0 = vsub.f32 1.5, %v1424_v62 }
 0x7dc   : > { %v1441_v1 = vadd.f32 %v1732_v60, %v1436_v63 }
 0x7dd   : > { %v1426_v2 = vmul.f32 %v1778_v55, %v1425_v0 }
 0x7de   : > { %1443 = vst.msk [vmem:[#allocation3] sm:$0xff] %vm659_vm1, %v1441_v1 }
 0x7df   : > { %v1430_v3 = vsel %vm1429_vm5, %v1778_v55, %v1426_v2 }
 0x7e0   : > { %v1432_v6 = vmul.f32 %v1430_v3, %v1398_v12 }
 0x7e2   : > { %v1437_v7 = vmul.f32 %v1731_v58, %v1432_v6 }
 0x7e4   : > { %v1442_v8 = vadd.f32 %v1732_v60, %v1437_v7 }
 0x7e6   : > { %1444 = vst.msk [vmem:[#allocation3 + $0x8] sm:$0xff] %vm659_vm1, %v1442_v8 }
 0x7e7   : > { %1695 = dma.vmem_to_hbm [thread:$0]  (%p1698_p5), %s1451_s16, 256, %s1453_s1, [#allocation4], %s1835_s21, %s1835_s21, %s1831_s29  }
 0x7e8   : > { %1812 = dma.done.wait (%p1698_p5), [#allocation4], 256  }
 0x7e9   : > { %1814 = vsyncadd (%p1698_p5), [#allocation4], 4294967040 }
 0x7ea PF: > { %s2216_s23 = sld [smem:[#allocation6_spill]] }
 0x7f0   : > { %s25_s29 = sadd.s32 1, %s2216_s23  }
 0x7f1   : > { %p22_p6 = scmp.ge.s32.totalorder %s25_s29, 4  }
 0x7f3   :  { %24 = sbr.rel (!%p22_p6) target bundleno = 8 (0x8), region = 140 }
 0x7f8   :  { %1469 = vsyncpa [#allocation4], 1 }
 0x7f9   :  { %1471 = vsyncpa [#allocation4 + $0x1], 1 }

</bundles_post_ra>
